<compile_context>
chip_gen: v5e
topology: v5e:2x2
jax: 0.10.0
libtpu: 0.0.40
codegen_flags: <defaults>
</compile_context>

<pallas_src>
import functools

import jax
import jax.numpy as jnp
from jax.experimental import pallas as pl
from jax.experimental.pallas import tpu as pltpu


def _round_up(x, m):
    return ((x + m - 1) // m) * m


# ---------------------------------------------------------------------------
# Kernel 1: time-chunked LSTM recurrence -> hidden states (T, B, H)
# ---------------------------------------------------------------------------
def _lstm_kernel(x_ref, wih_hbm, whh_hbm, b_hbm, h_out_ref,
                 h_sc, c_sc, wih_sc, whh_sc, b_sc, *, t_chunk, h_pad):
    """One grid step = t_chunk timesteps of the LSTM.

    x_ref     : (t_chunk, B_pad, E_pad)  embeddings for this chunk (VMEM block)
    wih_hbm   : (E_pad, 4*H_pad)         input->gates weights (HBM, pl.ANY)
    whh_hbm   : (H_pad, 4*H_pad)         hidden->gates weights (HBM, pl.ANY)
    b_hbm     : (1, 4*H_pad)             bias_ih + bias_hh (HBM, pl.ANY)
    h_out_ref : (t_chunk, B_pad, H_pad)  hidden states for this chunk
    h_sc/c_sc : (B_pad, H_pad)           recurrent state, persists across grid steps
    *_sc      : VMEM-resident single-buffered copies of the weights
    """
    step = pl.program_id(0)

    @pl.when(step == 0)
    def _init():
        h_sc[...] = jnp.zeros_like(h_sc)
        c_sc[...] = jnp.zeros_like(c_sc)
        # Grid-invariant weights: copy once, stay resident for all grid steps.
        pltpu.sync_copy(wih_hbm, wih_sc)
        pltpu.sync_copy(whh_hbm, whh_sc)
        pltpu.sync_copy(b_hbm, b_sc)

    w_ih = wih_sc[...]
    w_hh = whh_sc[...]
    bias = b_sc[...]
    H = h_pad

    def body(tt, carry):
        h, c = carry                                   # f32 (B_pad, H_pad)
        x_t = x_ref[tt]                                # (B_pad, E_pad)
        gates = (jnp.dot(x_t, w_ih, preferred_element_type=jnp.float32)
                 + jnp.dot(h.astype(w_hh.dtype), w_hh,
                           preferred_element_type=jnp.float32)
                 + bias)                               # (B_pad, 4*H_pad) f32
        # PyTorch gate order: input, forget, cell(g), output.
        # Each slice is a 128-aligned column block (H_pad is a multiple of 128).
        i_g = jax.nn.sigmoid(gates[:, 0 * H:1 * H])
        f_g = jax.nn.sigmoid(gates[:, 1 * H:2 * H])
        g_g = jnp.tanh(gates[:, 2 * H:3 * H])
        o_g = jax.nn.sigmoid(gates[:, 3 * H:4 * H])
        c_new = f_g * c + i_g * g_g
        h_new = o_g * jnp.tanh(c_new)
        h_out_ref[tt] = h_new.astype(h_out_ref.dtype)
        return h_new, c_new

    h_f, c_f = jax.lax.fori_loop(0, t_chunk, body, (h_sc[...], c_sc[...]),
                                 unroll=True)
    h_sc[...] = h_f
    c_sc[...] = c_f


def lstm_hidden_states_pallas(x_tbe, w_ih_t, w_hh_t, bias, *, t_chunk):
    """x_tbe: (T_pad, B_pad, E_pad) -> hidden states (T_pad, B_pad, H_pad)."""
    T_pad, B_pad, E_pad = x_tbe.shape
    H_pad = w_hh_t.shape[0]
    assert w_hh_t.shape[1] == 4 * H_pad and w_ih_t.shape == (E_pad, 4 * H_pad)
    assert T_pad % t_chunk == 0
    num_chunks = T_pad // t_chunk

    kernel = functools.partial(_lstm_kernel, t_chunk=t_chunk, h_pad=H_pad)

    return pl.pallas_call(
        kernel,
        out_shape=jax.ShapeDtypeStruct((T_pad, B_pad, H_pad), x_tbe.dtype),
        grid=(num_chunks,),
        in_specs=[
            pl.BlockSpec((t_chunk, B_pad, E_pad), lambda i: (i, 0, 0)),  # x chunk
            pl.BlockSpec(memory_space=pl.ANY),                           # W_ih^T
            pl.BlockSpec(memory_space=pl.ANY),                           # W_hh^T
            pl.BlockSpec(memory_space=pl.ANY),                           # bias
        ],
        out_specs=pl.BlockSpec((t_chunk, B_pad, H_pad), lambda i: (i, 0, 0)),
        scratch_shapes=[
            pltpu.VMEM((B_pad, H_pad), jnp.float32),        # h state
            pltpu.VMEM((B_pad, H_pad), jnp.float32),        # c state
            pltpu.VMEM((E_pad, 4 * H_pad), w_ih_t.dtype),   # resident W_ih^T
            pltpu.VMEM((H_pad, 4 * H_pad), w_hh_t.dtype),   # resident W_hh^T
            pltpu.VMEM((1, 4 * H_pad), jnp.float32),        # resident bias
        ],
        compiler_params=pltpu.CompilerParams(
            dimension_semantics=("arbitrary",),   # sequential recurrence
        ),
    )(x_tbe, w_ih_t, w_hh_t, bias)


# ---------------------------------------------------------------------------
# Kernel 2: vocab projection (B*T, H_pad) @ (H_pad, V_pad) tiled over rows and V
# ---------------------------------------------------------------------------
def _fc_kernel(h_ref, w_ref, b_ref, out_ref):
    out_ref[...] = (jnp.dot(h_ref[...], w_ref[...],
                            preferred_element_type=jnp.float32)
                    + b_ref[...])


def fc_pallas(h_rows, w_fc_t, b_fc, *, tm, tv):
    M_pad, H_pad = h_rows.shape
    V_pad = w_fc_t.shape[1]
    assert M_pad % tm == 0 and V_pad % tv == 0

    return pl.pallas_call(
        _fc_kernel,
        out_shape=jax.ShapeDtypeStruct((M_pad, V_pad), jnp.float32),
        grid=(M_pad // tm, V_pad // tv),
        in_specs=[
            pl.BlockSpec((tm, H_pad), lambda m, v: (m, 0)),
            pl.BlockSpec((H_pad, tv), lambda m, v: (0, v)),
            pl.BlockSpec((1, tv), lambda m, v: (0, v)),
        ],
        out_specs=pl.BlockSpec((tm, tv), lambda m, v: (m, v)),
        compiler_params=pltpu.CompilerParams(
            dimension_semantics=("parallel", "parallel"),   # both TCs on v7x
        ),
    )(h_rows, w_fc_t, b_fc)


# ---------------------------------------------------------------------------
# Model wrapper (matches the PyTorch DecoderRNN forward semantics)
# ---------------------------------------------------------------------------
class DecoderRNNPallas:
    """JAX/Pallas port of the PyTorch DecoderRNN forward pass."""

    def __init__(self, embed_size, hidden_size, vocab_size, num_layers=1,
                 key=None, matmul_dtype=jnp.float32, t_chunk=8):
        assert num_layers == 1, "reference module is used with num_layers=1"
        self.embed_size = embed_size
        self.hidden_size = hidden_size
        self.vocab_size = vocab_size
        self.matmul_dtype = matmul_dtype
        self.t_chunk = t_chunk

        if key is None:
            key = jax.random.PRNGKey(0)
        k_emb, k_wih, k_whh, k_bih, k_bhh, k_fc = jax.random.split(key, 6)

        # Raw parameters, same shapes / init intent as the torch module.
        self.embed_w = jax.random.uniform(
            k_emb, (vocab_size, embed_size), jnp.float32, -0.1, 0.1)
        stdv = 1.0 / (hidden_size ** 0.5)
        self.w_ih = jax.random.uniform(
            k_wih, (4 * hidden_size, embed_size), jnp.float32, -stdv, stdv)
        self.w_hh = jax.random.uniform(
            k_whh, (4 * hidden_size, hidden_size), jnp.float32, -stdv, stdv)
        self.b_ih = jax.random.uniform(
            k_bih, (4 * hidden_size,), jnp.float32, -stdv, stdv)
        self.b_hh = jax.random.uniform(
            k_bhh, (4 * hidden_size,), jnp.float32, -stdv, stdv)
        self.fc_w = jax.random.uniform(
            k_fc, (vocab_size, hidden_size), jnp.float32, -0.1, 0.1)
        self.fc_b = jnp.zeros((vocab_size,), jnp.float32)

        # ---- hardware-aligned padded dims ----
        H, E, V = hidden_size, embed_size, vocab_size
        self.H_pad = _round_up(H, 128)
        self.E_pad = _round_up(E, 128)
        self.TV = min(512, _round_up(V, 128))
        self.V_pad = _round_up(V, self.TV)
        Hp = self.H_pad

        # ---- pre-padded / pre-transposed weights (done once) ----
        # Gate-wise column padding: gate k occupies columns [k*Hp, k*Hp + H);
        # the padded columns get zero weights + zero bias -> their h/c lanes
        # stay exactly 0 forever (harmless).
        def pad_gate_mat(w_t, rows_pad):            # (rows, 4H) -> (rows_pad, 4*Hp)
            rows = w_t.shape[0]
            out = jnp.zeros((rows_pad, 4 * Hp), jnp.float32)
            for k in range(4):
                out = out.at[:rows, k * Hp:k * Hp + H].set(w_t[:, k * H:(k + 1) * H])
            return out

        def pad_gate_vec(b):                        # (4H,) -> (1, 4*Hp)
            out = jnp.zeros((1, 4 * Hp), jnp.float32)
            for k in range(4):
                out = out.at[0, k * Hp:k * Hp + H].set(b[k * H:(k + 1) * H])
            return out

        self.w_ih_pad = pad_gate_mat(self.w_ih.T, self.E_pad).astype(matmul_dtype)
        self.w_hh_pad = pad_gate_mat(self.w_hh.T, Hp).astype(matmul_dtype)
        self.bias_pad = pad_gate_vec(self.b_ih + self.b_hh)        # f32

        self.w_fc_pad = (jnp.zeros((Hp, self.V_pad), jnp.float32)
                         .at[:H, :V].set(self.fc_w.T).astype(matmul_dtype))
        self.b_fc_pad = jnp.zeros((1, self.V_pad), jnp.float32).at[0, :V].set(self.fc_b)

    def forward(self, features, captions):
        """features: (B, embed_size) float32, captions: (B, T) int
        returns logits (B, T, vocab_size) float32 (same as PyTorch)."""
        B = features.shape[0]
        T = captions.shape[1]
        E, H, V = self.embed_size, self.hidden_size, self.vocab_size
        Ep, Hp = self.E_pad, self.H_pad

        # ---- XLA glue: embedding gather + concat of image features ----
        # TODO(synk): embedding gather + the small (T,B,H)->(B,T,H) hidden-state
        # transpose stay in XLA; only the recurrence and the (large) vocab
        # projection are Pallas kernels.
        emb = jnp.take(self.embed_w, captions[:, :-1], axis=0)           # (B, T-1, E)
        x = jnp.concatenate(
            [features[:, None, :].astype(jnp.float32), emb], axis=1)     # (B, T, E)

        # Time-major + pad to hardware-aligned (T_pad, B_pad, E_pad).
        t_chunk = self.t_chunk
        T_pad = _round_up(T, t_chunk)
        B_pad = _round_up(B, 8)
        x_tbe = jnp.transpose(x, (1, 0, 2))                              # (T, B, E)
        x_tbe = (jnp.zeros((T_pad, B_pad, Ep), jnp.float32)
                 .at[:T, :B, :E].set(x_tbe).astype(self.matmul_dtype))

        # ---- kernel 1: LSTM recurrence -> hidden states ----
        h_all = lstm_hidden_states_pallas(
            x_tbe, self.w_ih_pad, self.w_hh_pad, self.bias_pad, t_chunk=t_chunk)

        # Transpose only the small hidden-state tensor; rows become batch-first
        # so the big logits tensor never needs a transpose.
        h_bt = jnp.transpose(h_all[:T, :B, :], (1, 0, 2)).reshape(B * T, Hp)

        M = B * T
        TM = min(128, _round_up(M, 8))
        M_pad = _round_up(M, TM)
        if M_pad != M:
            h_bt = jnp.zeros((M_pad, Hp), h_bt.dtype).at[:M].set(h_bt)

        # ---- kernel 2: vocab projection, tiled over rows and V ----
        logits = fc_pallas(h_bt, self.w_fc_pad, self.b_fc_pad, tm=TM, tv=self.TV)
        return logits[:M, :V].reshape(B, T, V)


# ---------------------------------------------------------------------------
# Pure-JAX reference (lax.scan LSTM) to validate the kernels
# ---------------------------------------------------------------------------
def _reference_forward(model, features, captions):
    emb = jnp.take(model.embed_w, captions[:, :-1], axis=0)
    x = jnp.concatenate([features[:, None, :], emb], axis=1)             # (B, T, E)
    B = x.shape[0]
    H = model.hidden_size

    def step(carry, x_t):
        h, c = carry
        gates = x_t @ model.w_ih.T + h @ model.w_hh.T + model.b_ih + model.b_hh
        i = jax.nn.sigmoid(gates[:, 0 * H:1 * H])
        f = jax.nn.sigmoid(gates[:, 1 * H:2 * H])
        g = jnp.tanh(gates[:, 2 * H:3 * H])
        o = jax.nn.sigmoid(gates[:, 3 * H:4 * H])
        c = f * c + i * g
        h = o * jnp.tanh(c)
        return (h, c), h

    h0 = jnp.zeros((B, H), jnp.float32)
    c0 = jnp.zeros((B, H), jnp.float32)
    _, hs = jax.lax.scan(step, (h0, c0), jnp.transpose(x, (1, 0, 2)))    # (T, B, H)
    outs = hs @ model.fc_w.T + model.fc_b                                # (T, B, V)
    return jnp.transpose(outs, (1, 0, 2))


if __name__ == "__main__":
    batch = 2
    embed_size = 32
    hidden_size = 32
    vocab_size = 128
    seq_len = 8          # LSTM sees T = seq_len (image features + seq_len-1 tokens)

    key = jax.random.PRNGKey(0)
    k_feat, k_cap, k_params = jax.random.split(key, 3)
    features = jax.random.normal(k_feat, (batch, embed_size), jnp.float32)
    captions = jax.random.randint(k_cap, (batch, seq_len), 0, vocab_size, jnp.int32)

    # f32 matmul path (exact parity with the reference); t_chunk=4 so the demo
    # exercises the multi-chunk state carry across grid steps.
    model = DecoderRNNPallas(embed_size, hidden_size, vocab_size,
                             num_layers=1, key=k_params,
                             matmul_dtype=jnp.float32, t_chunk=4)
    logits = jax.block_until_ready(model.forward(features, captions))

    ref = jax.block_until_ready(_reference_forward(model, features, captions))
    assert logits.shape == (batch, seq_len, vocab_size)
    assert jnp.allclose(logits, ref, atol=1e-4, rtol=1e-4), "f32 mismatch vs reference"

    # bf16 matmul inputs (v6e/v7x fast path); state & nonlinearities stay f32.
    model_bf16 = DecoderRNNPallas(embed_size, hidden_size, vocab_size,
                                  num_layers=1, key=k_params,
                                  matmul_dtype=jnp.bfloat16, t_chunk=4)
    logits_bf16 = jax.block_until_ready(model_bf16.forward(features, captions))
    assert logits_bf16.shape == (batch, seq_len, vocab_size)
    assert jnp.allclose(logits_bf16, ref, atol=5e-2, rtol=5e-2), "bf16 mismatch vs reference"

    print("KERNEL_OK")
</pallas_src>

<mosaic_0001>
module attributes {stable_mosaic.version = 11 : i64} {
  func.func @_lstm_kernel(%arg0: i32, %arg1: memref<4x8x128xf32, #tpu.memory_space<vmem>>, %arg2: memref<128x512xf32, #tpu.memory_space<any>>, %arg3: memref<128x512xf32, #tpu.memory_space<any>>, %arg4: memref<1x512xf32, #tpu.memory_space<any>>, %arg5: memref<4x8x128xf32, #tpu.memory_space<vmem>>, %arg6: memref<8x128xf32, #tpu.memory_space<vmem>>, %arg7: memref<8x128xf32, #tpu.memory_space<vmem>>, %arg8: memref<128x512xf32, #tpu.memory_space<vmem>>, %arg9: memref<128x512xf32, #tpu.memory_space<vmem>>, %arg10: memref<1x512xf32, #tpu.memory_space<vmem>>) attributes {dimension_semantics = [#tpu.dimension_semantics<arbitrary>], iteration_bounds = array<i64: 2>, scalar_prefetch = 0 : i64, scratch_operands = 5 : i64, tpu.core_type = #tpu.core_type<tc>, window_params = [{transform_indices = @transform_0, window_bounds = array<i64: 4, 8, 128>}, {}, {}, {}, {transform_indices = @transform_4, window_bounds = array<i64: 4, 8, 128>}]} {
    %c0_i32 = arith.constant 0 : i32
    %0 = arith.cmpi eq, %arg0, %c0_i32 : i32
    %1 = arith.extui %0 : i1 to i32
    %c0_i32_0 = arith.constant 0 : i32
    %2 = arith.cmpi ne, %1, %c0_i32_0 : i32
    scf.if %2 {
      %cst_50 = arith.constant 0.000000e+00 : f32
      %158 = vector.broadcast %cst_50 : f32 to vector<8x128xf32>
      %c0_51 = arith.constant 0 : index
      %c0_52 = arith.constant 0 : index
      %159 = vector.load %arg6[%c0_51, %c0_52] : memref<8x128xf32, #tpu.memory_space<vmem>>, vector<8x128xf32>
      tpu.vector_store %arg6[%c0_51, %c0_52], %158 {strides = array<i32>} : memref<8x128xf32, #tpu.memory_space<vmem>>, vector<8x128xf32>,
      %cst_53 = arith.constant 0.000000e+00 : f32
      %160 = vector.broadcast %cst_53 : f32 to vector<8x128xf32>
      %c0_54 = arith.constant 0 : index
      %c0_55 = arith.constant 0 : index
      %161 = vector.load %arg7[%c0_54, %c0_55] : memref<8x128xf32, #tpu.memory_space<vmem>>, vector<8x128xf32>
      tpu.vector_store %arg7[%c0_54, %c0_55], %160 {strides = array<i32>} : memref<8x128xf32, #tpu.memory_space<vmem>>, vector<8x128xf32>,
      "tpu.region"() ({
        %162 = tpu.sem_alloc : memref<!tpu.dma_semaphore, #tpu.memory_space<semaphore_mem>>
        tpu.enqueue_dma source(%arg2 : memref<128x512xf32, #tpu.memory_space<any>>) target(%arg8 : memref<128x512xf32, #tpu.memory_space<vmem>>) target_semaphore(%162 : memref<!tpu.dma_semaphore, #tpu.memory_space<semaphore_mem>>)
        tpu.wait_dma2 semaphore(%162 : memref<!tpu.dma_semaphore, #tpu.memory_space<semaphore_mem>>) src(%arg2 : memref<128x512xf32, #tpu.memory_space<any>>) dst(%arg8 : memref<128x512xf32, #tpu.memory_space<vmem>>)
        tpu.yield
      }) : () -> ()
      "tpu.region"() ({
        %162 = tpu.sem_alloc : memref<!tpu.dma_semaphore, #tpu.memory_space<semaphore_mem>>
        tpu.enqueue_dma source(%arg3 : memref<128x512xf32, #tpu.memory_space<any>>) target(%arg9 : memref<128x512xf32, #tpu.memory_space<vmem>>) target_semaphore(%162 : memref<!tpu.dma_semaphore, #tpu.memory_space<semaphore_mem>>)
        tpu.wait_dma2 semaphore(%162 : memref<!tpu.dma_semaphore, #tpu.memory_space<semaphore_mem>>) src(%arg3 : memref<128x512xf32, #tpu.memory_space<any>>) dst(%arg9 : memref<128x512xf32, #tpu.memory_space<vmem>>)
        tpu.yield
      }) : () -> ()
      "tpu.region"() ({
        %162 = tpu.sem_alloc : memref<!tpu.dma_semaphore, #tpu.memory_space<semaphore_mem>>
        tpu.enqueue_dma source(%arg4 : memref<1x512xf32, #tpu.memory_space<any>>) target(%arg10 : memref<1x512xf32, #tpu.memory_space<vmem>>) target_semaphore(%162 : memref<!tpu.dma_semaphore, #tpu.memory_space<semaphore_mem>>)
        tpu.wait_dma2 semaphore(%162 : memref<!tpu.dma_semaphore, #tpu.memory_space<semaphore_mem>>) src(%arg4 : memref<1x512xf32, #tpu.memory_space<any>>) dst(%arg10 : memref<1x512xf32, #tpu.memory_space<vmem>>)
        tpu.yield
      }) : () -> ()
    } else {
    }
    %c0 = arith.constant 0 : index
    %c0_1 = arith.constant 0 : index
    %3 = vector.load %arg8[%c0, %c0_1] : memref<128x512xf32, #tpu.memory_space<vmem>>, vector<128x512xf32>
    %c0_2 = arith.constant 0 : index
    %c0_3 = arith.constant 0 : index
    %4 = vector.load %arg9[%c0_2, %c0_3] : memref<128x512xf32, #tpu.memory_space<vmem>>, vector<128x512xf32>
    %c0_4 = arith.constant 0 : index
    %c0_5 = arith.constant 0 : index
    %5 = vector.load %arg10[%c0_4, %c0_5] : memref<1x512xf32, #tpu.memory_space<vmem>>, vector<1x512xf32>
    %c0_6 = arith.constant 0 : index
    %c0_7 = arith.constant 0 : index
    %6 = vector.load %arg6[%c0_6, %c0_7] : memref<8x128xf32, #tpu.memory_space<vmem>>, vector<8x128xf32>
    %c0_8 = arith.constant 0 : index
    %c0_9 = arith.constant 0 : index
    %7 = vector.load %arg7[%c0_8, %c0_9] : memref<8x128xf32, #tpu.memory_space<vmem>>, vector<8x128xf32>
    %c0_i32_10 = arith.constant 0 : i32
    %8 = arith.index_cast %c0_i32_10 : i32 to index
    %c0_11 = arith.constant 0 : index
    %c0_12 = arith.constant 0 : index
    %9 = vector.load %arg1[%8, %c0_11, %c0_12] : memref<4x8x128xf32, #tpu.memory_space<vmem>>, vector<1x8x128xf32>
    %10 = vector.shape_cast %9 : vector<1x8x128xf32> to vector<8x128xf32>
    %cst = arith.constant dense<0.000000e+00> : vector<8x512xf32>
    %11 = tpu.matmul %10, %3, %cst {dimension_numbers = #tpu.dot_dimension_numbers<[1], [0], [0], [1], [0, 0, 1, 1], [], []>} : vector<8x128xf32>, vector<128x512xf32>, vector<8x512xf32> -> vector<8x512xf32>
    %cst_13 = arith.constant dense<0.000000e+00> : vector<8x512xf32>
    %12 = tpu.matmul %6, %4, %cst_13 {dimension_numbers = #tpu.dot_dimension_numbers<[1], [0], [0], [1], [0, 0, 1, 1], [], []>} : vector<8x128xf32>, vector<128x512xf32>, vector<8x512xf32> -> vector<8x512xf32>
    %13 = arith.addf %11, %12 : vector<8x512xf32>
    %14 = vector.broadcast %5 : vector<1x512xf32> to vector<8x512xf32>
    %15 = arith.addf %13, %14 : vector<8x512xf32>
    %16 = vector.extract_strided_slice %15 {offsets = [0, 0], sizes = [8, 128], strides = [1, 1]} : vector<8x512xf32> to vector<8x128xf32>
    %17 = arith.negf %16 : vector<8x128xf32>
    %18 = math.exp %17 : vector<8x128xf32>
    %cst_14 = arith.constant 1.000000e+00 : f32
    %19 = vector.broadcast %cst_14 : f32 to vector<8x128xf32>
    %20 = arith.addf %19, %18 : vector<8x128xf32>
    %21 = arith.divf %19, %20 : vector<8x128xf32>
    %22 = vector.extract_strided_slice %15 {offsets = [0, 128], sizes = [8, 128], strides = [1, 1]} : vector<8x512xf32> to vector<8x128xf32>
    %23 = arith.negf %22 : vector<8x128xf32>
    %24 = math.exp %23 : vector<8x128xf32>
    %cst_15 = arith.constant 1.000000e+00 : f32
    %25 = vector.broadcast %cst_15 : f32 to vector<8x128xf32>
    %26 = arith.addf %25, %24 : vector<8x128xf32>
    %27 = arith.divf %25, %26 : vector<8x128xf32>
    %28 = vector.extract_strided_slice %15 {offsets = [0, 256], sizes = [8, 128], strides = [1, 1]} : vector<8x512xf32> to vector<8x128xf32>
    %29 = math.tanh %28 : vector<8x128xf32>
    %30 = vector.extract_strided_slice %15 {offsets = [0, 384], sizes = [8, 128], strides = [1, 1]} : vector<8x512xf32> to vector<8x128xf32>
    %31 = arith.negf %30 : vector<8x128xf32>
    %32 = math.exp %31 : vector<8x128xf32>
    %cst_16 = arith.constant 1.000000e+00 : f32
    %33 = vector.broadcast %cst_16 : f32 to vector<8x128xf32>
    %34 = arith.addf %33, %32 : vector<8x128xf32>
    %35 = arith.divf %33, %34 : vector<8x128xf32>
    %36 = arith.mulf %27, %7 : vector<8x128xf32>
    %37 = arith.mulf %21, %29 : vector<8x128xf32>
    %38 = arith.addf %36, %37 : vector<8x128xf32>
    %39 = math.tanh %38 : vector<8x128xf32>
    %40 = arith.mulf %35, %39 : vector<8x128xf32>
    %41 = arith.index_cast %c0_i32_10 : i32 to index
    %c0_17 = arith.constant 0 : index
    %c0_18 = arith.constant 0 : index
    %42 = vector.load %arg5[%41, %c0_17, %c0_18] : memref<4x8x128xf32, #tpu.memory_space<vmem>>, vector<1x8x128xf32>
    %43 = vector.shape_cast %42 : vector<1x8x128xf32> to vector<8x128xf32>
    %44 = vector.shape_cast %40 : vector<8x128xf32> to vector<1x8x128xf32>
    tpu.vector_store %arg5[%41, %c0_17, %c0_18], %44 {strides = array<i32>} : memref<4x8x128xf32, #tpu.memory_space<vmem>>, vector<1x8x128xf32>,
    %c1_i32 = arith.constant 1 : i32
    %45 = arith.index_cast %c1_i32 : i32 to index
    %c0_19 = arith.constant 0 : index
    %c0_20 = arith.constant 0 : index
    %46 = vector.load %arg1[%45, %c0_19, %c0_20] : memref<4x8x128xf32, #tpu.memory_space<vmem>>, vector<1x8x128xf32>
    %47 = vector.shape_cast %46 : vector<1x8x128xf32> to vector<8x128xf32>
    %cst_21 = arith.constant dense<0.000000e+00> : vector<8x512xf32>
    %48 = tpu.matmul %47, %3, %cst_21 {dimension_numbers = #tpu.dot_dimension_numbers<[1], [0], [0], [1], [0, 0, 1, 1], [], []>} : vector<8x128xf32>, vector<128x512xf32>, vector<8x512xf32> -> vector<8x512xf32>
    %cst_22 = arith.constant dense<0.000000e+00> : vector<8x512xf32>
    %49 = tpu.matmul %40, %4, %cst_22 {dimension_numbers = #tpu.dot_dimension_numbers<[1], [0], [0], [1], [0, 0, 1, 1], [], []>} : vector<8x128xf32>, vector<128x512xf32>, vector<8x512xf32> -> vector<8x512xf32>
    %50 = arith.addf %48, %49 : vector<8x512xf32>
    %51 = vector.broadcast %5 : vector<1x512xf32> to vector<8x512xf32>
    %52 = arith.addf %50, %51 : vector<8x512xf32>
    %53 = vector.extract_strided_slice %52 {offsets = [0, 0], sizes = [8, 128], strides = [1, 1]} : vector<8x512xf32> to vector<8x128xf32>
    %54 = arith.negf %53 : vector<8x128xf32>
    %55 = math.exp %54 : vector<8x128xf32>
    %cst_23 = arith.constant 1.000000e+00 : f32
    %56 = vector.broadcast %cst_23 : f32 to vector<8x128xf32>
    %57 = arith.addf %56, %55 : vector<8x128xf32>
    %58 = arith.divf %56, %57 : vector<8x128xf32>
    %59 = vector.extract_strided_slice %52 {offsets = [0, 128], sizes = [8, 128], strides = [1, 1]} : vector<8x512xf32> to vector<8x128xf32>
    %60 = arith.negf %59 : vector<8x128xf32>
    %61 = math.exp %60 : vector<8x128xf32>
    %cst_24 = arith.constant 1.000000e+00 : f32
    %62 = vector.broadcast %cst_24 : f32 to vector<8x128xf32>
    %63 = arith.addf %62, %61 : vector<8x128xf32>
    %64 = arith.divf %62, %63 : vector<8x128xf32>
    %65 = vector.extract_strided_slice %52 {offsets = [0, 256], sizes = [8, 128], strides = [1, 1]} : vector<8x512xf32> to vector<8x128xf32>
    %66 = math.tanh %65 : vector<8x128xf32>
    %67 = vector.extract_strided_slice %52 {offsets = [0, 384], sizes = [8, 128], strides = [1, 1]} : vector<8x512xf32> to vector<8x128xf32>
    %68 = arith.negf %67 : vector<8x128xf32>
    %69 = math.exp %68 : vector<8x128xf32>
    %cst_25 = arith.constant 1.000000e+00 : f32
    %70 = vector.broadcast %cst_25 : f32 to vector<8x128xf32>
    %71 = arith.addf %70, %69 : vector<8x128xf32>
    %72 = arith.divf %70, %71 : vector<8x128xf32>
    %73 = arith.mulf %64, %38 : vector<8x128xf32>
    %74 = arith.mulf %58, %66 : vector<8x128xf32>
    %75 = arith.addf %73, %74 : vector<8x128xf32>
    %76 = math.tanh %75 : vector<8x128xf32>
    %77 = arith.mulf %72, %76 : vector<8x128xf32>
    %78 = arith.index_cast %c1_i32 : i32 to index
    %c0_26 = arith.constant 0 : index
    %c0_27 = arith.constant 0 : index
    %79 = vector.load %arg5[%78, %c0_26, %c0_27] : memref<4x8x128xf32, #tpu.memory_space<vmem>>, vector<1x8x128xf32>
    %80 = vector.shape_cast %79 : vector<1x8x128xf32> to vector<8x128xf32>
    %81 = vector.shape_cast %77 : vector<8x128xf32> to vector<1x8x128xf32>
    tpu.vector_store %arg5[%78, %c0_26, %c0_27], %81 {strides = array<i32>} : memref<4x8x128xf32, #tpu.memory_space<vmem>>, vector<1x8x128xf32>,
    %c2_i32 = arith.constant 2 : i32
    %82 = arith.index_cast %c2_i32 : i32 to index
    %c0_28 = arith.constant 0 : index
    %c0_29 = arith.constant 0 : index
    %83 = vector.load %arg1[%82, %c0_28, %c0_29] : memref<4x8x128xf32, #tpu.memory_space<vmem>>, vector<1x8x128xf32>
    %84 = vector.shape_cast %83 : vector<1x8x128xf32> to vector<8x128xf32>
    %cst_30 = arith.constant dense<0.000000e+00> : vector<8x512xf32>
    %85 = tpu.matmul %84, %3, %cst_30 {dimension_numbers = #tpu.dot_dimension_numbers<[1], [0], [0], [1], [0, 0, 1, 1], [], []>} : vector<8x128xf32>, vector<128x512xf32>, vector<8x512xf32> -> vector<8x512xf32>
    %cst_31 = arith.constant dense<0.000000e+00> : vector<8x512xf32>
    %86 = tpu.matmul %77, %4, %cst_31 {dimension_numbers = #tpu.dot_dimension_numbers<[1], [0], [0], [1], [0, 0, 1, 1], [], []>} : vector<8x128xf32>, vector<128x512xf32>, vector<8x512xf32> -> vector<8x512xf32>
    %87 = arith.addf %85, %86 : vector<8x512xf32>
    %88 = vector.broadcast %5 : vector<1x512xf32> to vector<8x512xf32>
    %89 = arith.addf %87, %88 : vector<8x512xf32>
    %90 = vector.extract_strided_slice %89 {offsets = [0, 0], sizes = [8, 128], strides = [1, 1]} : vector<8x512xf32> to vector<8x128xf32>
    %91 = arith.negf %90 : vector<8x128xf32>
    %92 = math.exp %91 : vector<8x128xf32>
    %cst_32 = arith.constant 1.000000e+00 : f32
    %93 = vector.broadcast %cst_32 : f32 to vector<8x128xf32>
    %94 = arith.addf %93, %92 : vector<8x128xf32>
    %95 = arith.divf %93, %94 : vector<8x128xf32>
    %96 = vector.extract_strided_slice %89 {offsets = [0, 128], sizes = [8, 128], strides = [1, 1]} : vector<8x512xf32> to vector<8x128xf32>
    %97 = arith.negf %96 : vector<8x128xf32>
    %98 = math.exp %97 : vector<8x128xf32>
    %cst_33 = arith.constant 1.000000e+00 : f32
    %99 = vector.broadcast %cst_33 : f32 to vector<8x128xf32>
    %100 = arith.addf %99, %98 : vector<8x128xf32>
    %101 = arith.divf %99, %100 : vector<8x128xf32>
    %102 = vector.extract_strided_slice %89 {offsets = [0, 256], sizes = [8, 128], strides = [1, 1]} : vector<8x512xf32> to vector<8x128xf32>
    %103 = math.tanh %102 : vector<8x128xf32>
    %104 = vector.extract_strided_slice %89 {offsets = [0, 384], sizes = [8, 128], strides = [1, 1]} : vector<8x512xf32> to vector<8x128xf32>
    %105 = arith.negf %104 : vector<8x128xf32>
    %106 = math.exp %105 : vector<8x128xf32>
    %cst_34 = arith.constant 1.000000e+00 : f32
    %107 = vector.broadcast %cst_34 : f32 to vector<8x128xf32>
    %108 = arith.addf %107, %106 : vector<8x128xf32>
    %109 = arith.divf %107, %108 : vector<8x128xf32>
    %110 = arith.mulf %101, %75 : vector<8x128xf32>
    %111 = arith.mulf %95, %103 : vector<8x128xf32>
    %112 = arith.addf %110, %111 : vector<8x128xf32>
    %113 = math.tanh %112 : vector<8x128xf32>
    %114 = arith.mulf %109, %113 : vector<8x128xf32>
    %115 = arith.index_cast %c2_i32 : i32 to index
    %c0_35 = arith.constant 0 : index
    %c0_36 = arith.constant 0 : index
    %116 = vector.load %arg5[%115, %c0_35, %c0_36] : memref<4x8x128xf32, #tpu.memory_space<vmem>>, vector<1x8x128xf32>
    %117 = vector.shape_cast %116 : vector<1x8x128xf32> to vector<8x128xf32>
    %118 = vector.shape_cast %114 : vector<8x128xf32> to vector<1x8x128xf32>
    tpu.vector_store %arg5[%115, %c0_35, %c0_36], %118 {strides = array<i32>} : memref<4x8x128xf32, #tpu.memory_space<vmem>>, vector<1x8x128xf32>,
    %c3_i32 = arith.constant 3 : i32
    %119 = arith.index_cast %c3_i32 : i32 to index
    %c0_37 = arith.constant 0 : index
    %c0_38 = arith.constant 0 : index
    %120 = vector.load %arg1[%119, %c0_37, %c0_38] : memref<4x8x128xf32, #tpu.memory_space<vmem>>, vector<1x8x128xf32>
    %121 = vector.shape_cast %120 : vector<1x8x128xf32> to vector<8x128xf32>
    %cst_39 = arith.constant dense<0.000000e+00> : vector<8x512xf32>
    %122 = tpu.matmul %121, %3, %cst_39 {dimension_numbers = #tpu.dot_dimension_numbers<[1], [0], [0], [1], [0, 0, 1, 1], [], []>} : vector<8x128xf32>, vector<128x512xf32>, vector<8x512xf32> -> vector<8x512xf32>
    %cst_40 = arith.constant dense<0.000000e+00> : vector<8x512xf32>
    %123 = tpu.matmul %114, %4, %cst_40 {dimension_numbers = #tpu.dot_dimension_numbers<[1], [0], [0], [1], [0, 0, 1, 1], [], []>} : vector<8x128xf32>, vector<128x512xf32>, vector<8x512xf32> -> vector<8x512xf32>
    %124 = arith.addf %122, %123 : vector<8x512xf32>
    %125 = vector.broadcast %5 : vector<1x512xf32> to vector<8x512xf32>
    %126 = arith.addf %124, %125 : vector<8x512xf32>
    %127 = vector.extract_strided_slice %126 {offsets = [0, 0], sizes = [8, 128], strides = [1, 1]} : vector<8x512xf32> to vector<8x128xf32>
    %128 = arith.negf %127 : vector<8x128xf32>
    %129 = math.exp %128 : vector<8x128xf32>
    %cst_41 = arith.constant 1.000000e+00 : f32
    %130 = vector.broadcast %cst_41 : f32 to vector<8x128xf32>
    %131 = arith.addf %130, %129 : vector<8x128xf32>
    %132 = arith.divf %130, %131 : vector<8x128xf32>
    %133 = vector.extract_strided_slice %126 {offsets = [0, 128], sizes = [8, 128], strides = [1, 1]} : vector<8x512xf32> to vector<8x128xf32>
    %134 = arith.negf %133 : vector<8x128xf32>
    %135 = math.exp %134 : vector<8x128xf32>
    %cst_42 = arith.constant 1.000000e+00 : f32
    %136 = vector.broadcast %cst_42 : f32 to vector<8x128xf32>
    %137 = arith.addf %136, %135 : vector<8x128xf32>
    %138 = arith.divf %136, %137 : vector<8x128xf32>
    %139 = vector.extract_strided_slice %126 {offsets = [0, 256], sizes = [8, 128], strides = [1, 1]} : vector<8x512xf32> to vector<8x128xf32>
    %140 = math.tanh %139 : vector<8x128xf32>
    %141 = vector.extract_strided_slice %126 {offsets = [0, 384], sizes = [8, 128], strides = [1, 1]} : vector<8x512xf32> to vector<8x128xf32>
    %142 = arith.negf %141 : vector<8x128xf32>
    %143 = math.exp %142 : vector<8x128xf32>
    %cst_43 = arith.constant 1.000000e+00 : f32
    %144 = vector.broadcast %cst_43 : f32 to vector<8x128xf32>
    %145 = arith.addf %144, %143 : vector<8x128xf32>
    %146 = arith.divf %144, %145 : vector<8x128xf32>
    %147 = arith.mulf %138, %112 : vector<8x128xf32>
    %148 = arith.mulf %132, %140 : vector<8x128xf32>
    %149 = arith.addf %147, %148 : vector<8x128xf32>
    %150 = math.tanh %149 : vector<8x128xf32>
    %151 = arith.mulf %146, %150 : vector<8x128xf32>
    %152 = arith.index_cast %c3_i32 : i32 to index
    %c0_44 = arith.constant 0 : index
    %c0_45 = arith.constant 0 : index
    %153 = vector.load %arg5[%152, %c0_44, %c0_45] : memref<4x8x128xf32, #tpu.memory_space<vmem>>, vector<1x8x128xf32>
    %154 = vector.shape_cast %153 : vector<1x8x128xf32> to vector<8x128xf32>
    %155 = vector.shape_cast %151 : vector<8x128xf32> to vector<1x8x128xf32>
    tpu.vector_store %arg5[%152, %c0_44, %c0_45], %155 {strides = array<i32>} : memref<4x8x128xf32, #tpu.memory_space<vmem>>, vector<1x8x128xf32>,
    %c4_i32 = arith.constant 4 : i32
    %c0_46 = arith.constant 0 : index
    %c0_47 = arith.constant 0 : index
    %156 = vector.load %arg6[%c0_46, %c0_47] : memref<8x128xf32, #tpu.memory_space<vmem>>, vector<8x128xf32>
    tpu.vector_store %arg6[%c0_46, %c0_47], %151 {strides = array<i32>} : memref<8x128xf32, #tpu.memory_space<vmem>>, vector<8x128xf32>,
    %c0_48 = arith.constant 0 : index
    %c0_49 = arith.constant 0 : index
    %157 = vector.load %arg7[%c0_48, %c0_49] : memref<8x128xf32, #tpu.memory_space<vmem>>, vector<8x128xf32>
    tpu.vector_store %arg7[%c0_48, %c0_49], %149 {strides = array<i32>} : memref<8x128xf32, #tpu.memory_space<vmem>>, vector<8x128xf32>,
    return
  }
  func.func @transform_0(%arg0: i32) -> (i32, i32, i32) {
    %c0_i32 = arith.constant 0 : i32
    %c0_i32_0 = arith.constant 0 : i32
    %c0_i32_1 = arith.constant 0 : i32
    return %arg0, %c0_i32, %c0_i32_0 : i32, i32, i32
  }
  func.func @transform_4(%arg0: i32) -> (i32, i32, i32) {
    %c0_i32 = arith.constant 0 : i32
    %c0_i32_0 = arith.constant 0 : i32
    %c0_i32_1 = arith.constant 0 : i32
    return %arg0, %c0_i32, %c0_i32_0 : i32, i32, i32
  }
}

</mosaic_0001>

<bundles_post_ra>
// kernel: tpu_custom_call.1
= control target key start
LH: loop header
LB: loop body
LE: loop exit
PB: predicated region body
PF: predicated region fallthrough
CT: control target
= control target key end

     0   :  { %9 = vsyncpa [#allocation8], 0  ;;  %s2667_s0 = inlined_call_operand.hbm [shape: f32[8,8,128], index: 0, kind: input, shape index: {}]   ;;  %s2668_s1 = inlined_call_operand.hbm [shape: f32[128,512], index: 1, kind: input, shape index: {}]   ;;  %s2669_s2 = inlined_call_operand.hbm [shape: f32[128,512], index: 2, kind: input, shape index: {}]   ;;  %s2670_s3 = inlined_call_operand.hbm [shape: f32[1,512], index: 3, kind: input, shape index: {}]   ;;  %s2671_s4 = inlined_call_operand.hbm [shape: f32[8,8,128], index: 4, kind: output, shape index: {}]  }
   0x1   :  { %11 = vsyncpa [#allocation8 + $0x1], 0 }
   0x2   :  { %12 = vsyncpa [#allocation9], 0 }
   0x3   :  { %14 = vsyncpa [#allocation9 + $0x1], 0  ;;  %s1841_s15 = smov 0   ;;  %s1843_s16 = smov 0  }
   0x4   :  { %s1845_s17 = smov 0   ;;  %s1847_s18 = smov 0  }
   0x5 LB: > { %s1862_s19 = sadd.s32 4294967295, %s1806_s18   ;;  %s1351_s20 = sadd.s32 4294967294, %s1806_s18   ;;  %s1806_s18 = sphi %s1847_s18, %s3097_s18   ;;  %s1802_s17 = sphi %s1845_s17, %s3096_s17   ;;  %s1798_s16 = sphi %s1843_s16, %s3095_s16   ;;  %s1794_s15 = sphi %s1841_s15, %s3094_s15  }
   0x6   : > { %s1866_s21 = sadd.s32 1, %s1806_s18   ;;  %s27_s22 = sadd.s32 1, %s1802_s17 }
   0x7   : > { %s24_s23 = ssub.s32 %s1806_s18, %s1866_s21  ;;  %p34_p0 = scmp.ne.s32.totalorder %s1802_s17, %s1798_s16 }
   0x8   : > { %p25_p1 = scmp.eq.s32.totalorder %s24_s23, 0  ;;  %p35_p2 = scmp.eq.s32.totalorder %s1806_s18, 0 }
   0x9   : > { %p40_p3 = scmp.ne.s32.totalorder %s1798_s16, %s1794_s15  ;;  %p41_p4 = scmp.eq.s32.totalorder %s1862_s19, 0 }
   0xa   : > { %s1878_s24 = scalar_select %p25_p1, %s1802_s17, %s27_s22  }
   0xb   : > { %p1880_p5 = por %p35_p2, %p34_p0  ;;  %p1884_p6 = por %p41_p4, %p40_p3 }
   0xc   : > { %p64_p7 = scmp.eq.s32.totalorder %s1862_s19, 1  ;;  %p70_p8 = scmp.eq.s32.totalorder %s1351_s20, 1 }
   0xd   : > { %p1398_p10 = scmp.lt.s32.totalorder %s1806_s18, 2  ;;  %s90_s29 = sand.u32 1, %s1802_s17  }
   0xe   : > { %p1891_p11 = por %p64_p7, %p34_p0  ;;  %p1895_p12 = por %p70_p8, %p40_p3 }
   0xf   : > { %s1384_s30 = sshll.u32 %s1806_s18, 5  ;;  %s1354_s5 = sshll.u32 %s90_s29, 5 }
  0x10   : > { %s99_s8 = scalar_lea.hbm %s2667_s0, %s1384_s30  ;;  %s94_s10 = scalar_lea.vmem [#allocation7], %s1354_s5 }
  0x11   : > { %s100_s9 = sshll.u32 %s99_s8, 4  ;;  %s102_s11 = sshll.u32 %s94_s10, 4  ;;  %s101_s9 = int_to_ptr.hbm [resolvable:$true] %s100_s9  ;;  %s103_s11 = int_to_ptr.vmem [resolvable:$true] %s102_s11 }
  0x12   : > { %p1906_p13 = pnand %p1398_p10, %p1880_p5  ;;  %p1357_p0 = scmp.ge.s32.totalorder %s1806_s18, 1 }
  0x13   : > { %p110_p1 = scmp.lt.s32.totalorder %s1806_s18, 3  ;;  %s91_s13 = scalar_lea.sflag [#allocation8], %s90_s29 }
  0x14   : > { %s1632_s14 = sshra.s32 %s101_s9, 4  ;;  %p1636_p3 = pneg %p1906_p13  ;;  %s1633_s14 = int_to_ptr.hbm [resolvable:$true] %s1632_s14 }
  0x15   : > { %s1634_s20 = scalar_lea.hbm %s1633_s14, 32  ;;  %s1639_s25 = scalar_lea.hbm %s2667_s0, 64 }
  0x16   : > { %p1635_p2 = scmp.ne.s32.totalorder %s1633_s14, %s1634_s20  ;;  %p1640_p5 = scmp.lt.s32.totalorder %s1633_s14, %s2667_s0 }
  0x17   : > { %p1641_p8 = scmp.lt.s32.totalorder %s1639_s25, %s1634_s20 }
  0x18   : > { %p1637_p4 = pnand %p1636_p3, %p1635_p2 }
  0x19   : > { %p1642_p10 = por %p1641_p8, %p1640_p5 }
  0x1a   : > { %p1638_p7 = pneg %p1637_p4 }
  0x1c   : > { %p1643_p9 = pnand %p1642_p10, %p1638_p7 }
  0x1e   : > { %1646 = shalt.err (!%p1643_p9)
}
  0x1f   : > { %s1808_s29 = smov 128   ;;  %s1809_s6 = smov 8  }
  0x20   : > { %1393 = dma.hbm_to_vmem [thread:$0]  (!%p1906_p13), %s101_s9, 512, %s103_s11, %s91_s13, %s1808_s29, %s1808_s29, %s1809_s6  }
  0x21   : > { %p111_p2 = pnand %p1357_p0, %p110_p1 }
  0x23   : > { %114 = sbr.rel (%p111_p2) target bundleno = 876 (0x36c), region = 24 }
  0x28   : > { %s1927_s7 = sand.u32 1, %s1798_s16  }
  0x29   : > { %s1358_s8 = sshll.u32 %s1927_s7, 5  ;;  %s117_s10 = scalar_lea.sflag [#allocation8], %s1927_s7 }
  0x2a   : > { %s1931_s14 = scalar_lea.vmem [#allocation7], %s1358_s8 }
  0x2b   : > { %1779 = dma.done.wait (%p1884_p6), %s117_s10, 512  }
  0x2c   : > { %1781 = vsyncadd (%p1884_p6), %s117_s10, 4294966784  ;;  %s1937_s9 = scalar_lea.vmem [#allocation10], %s1358_s8  ;;  %p1360_p9 = scmp.ne.s32.totalorder %s1862_s19, 0 }
  0x2e   : > { %145 = sbr.rel (%p1360_p9) target bundleno = 69 (0x45), region = 32 }
  0x33   : > { %v1810_v0 = vmov 0.0  }
  0x34   : > { %146 = vst [vmem:[#allocation2] sm:$0xff] %v1810_v0 }
  0x35   : > { %147 = vst [vmem:[#allocation3] sm:$0xff] %v1810_v0 }
  0x36   : > { %s155_s13 = sshll.u32 %s2668_s1, 4  ;;  %s1811_s20 = smov [#allocation4]   ;;  %s156_s13 = int_to_ptr.hbm [resolvable:$true] %s155_s13 }
  0x37   : > { %s157_s22 = sshll.u32 %s1811_s20, 4  ;;  %s158_s22 = int_to_ptr.vmem [resolvable:$true] %s157_s22 }
  0x38   : > { %160 = dma.hbm_to_vmem [thread:$0]  %s156_s13, 8192, %s158_s22, [#allocation11] }
  0x39   : > { %1782 = dma.done.wait [#allocation11], 8192 }
  0x3a   : > { %1783 = vsyncadd [#allocation11], 4294959104 }
  0x3b   : > { %s172_s25 = sshll.u32 %s2669_s2, 4  ;;  %s1812_s30 = smov [#allocation5]   ;;  %s173_s25 = int_to_ptr.hbm [resolvable:$true] %s172_s25 }
  0x3c   : > { %s174_s5 = sshll.u32 %s1812_s30, 4  ;;  %s175_s5 = int_to_ptr.vmem [resolvable:$true] %s174_s5 }
  0x3d   : > { %177 = dma.hbm_to_vmem [thread:$0]  %s173_s25, 8192, %s175_s5, [#allocation16] }
  0x3e   : > { %1784 = dma.done.wait [#allocation16], 8192 }
  0x3f   : > { %1785 = vsyncadd [#allocation16], 4294959104 }
  0x40   : > { %s189_s8 = sshll.u32 %s2670_s3, 4  ;;  %s1813_s10 = smov [#allocation6]   ;;  %s190_s8 = int_to_ptr.hbm [resolvable:$true] %s189_s8 }
  0x41   : > { %s191_s11 = sshll.u32 %s1813_s10, 4  ;;  %s192_s11 = int_to_ptr.vmem [resolvable:$true] %s191_s11 }
  0x42   : > { %194 = dma.hbm_to_vmem [thread:$0]  %s190_s8, 64, %s192_s11, [#allocation19] }
  0x43   : > { %1786 = dma.done.wait [#allocation19], 64 }
  0x44   : > { %1787 = vsyncadd [#allocation19], 4294967232 }
  0x45 PF: > { %v1949_v1 = vld [vmem:[#allocation5 + $0x1e0] sm:$0xff]  ;;  %v1951_v2 = vld [vmem:[#allocation5 + $0x1e8] sm:$0xff]  ;;  %v1953_v3 = vld [vmem:[#allocation5 + $0x1f8] sm:$0xff]  ;;  %s1275_s22 = sshll.u32 %s1937_s9, 4  ;;  %s1754_s29 = scalar_lea.hbm %s2671_s4, 64  ;;  %s1276_s22 = int_to_ptr.vmem [resolvable:$true] %s1275_s22 }
  0x46   : > { %330 = vmatpush.msra.mxu0 %v1949_v1  ;;  %350 = vmatpush.msra.mxu1 %v1951_v2  ;;  %v1957_v4 = vld [vmem:[#allocation5 + $0x1c0] sm:$0xff]  ;;  %v1959_v5 = vld [vmem:[#allocation5 + $0x1c8] sm:$0xff]  ;;  %v1961_v6 = vld [vmem:[#allocation5 + $0x1d8] sm:$0xff] }
  0x47   : > { %390 = vmatpush.msra.mxu3 %v1953_v3  ;;  %v1964_v7 = vld [vmem:[#allocation5 + $0x1a0] sm:$0xff]  ;;  %v1966_v8 = vld [vmem:[#allocation5 + $0x1a8] sm:$0xff]  ;;  %v1970_v9 = vld [vmem:[#allocation5 + $0x1b8] sm:$0xff] }
  0x48   : > { %331 = vmatpush.msra.mxu0 %v1957_v4  ;;  %351 = vmatpush.msra.mxu1 %v1959_v5  ;;  %v1973_v10 = vld [vmem:[#allocation5 + $0x180] sm:$0xff]  ;;  %v1975_v11 = vld [vmem:[#allocation5 + $0x188] sm:$0xff]  ;;  %v1977_v12 = vld [vmem:[#allocation5 + $0x1f0] sm:$0xff] }
  0x49   : > { %391 = vmatpush.msra.mxu3 %v1961_v6  ;;  %v1981_v13 = vld [vmem:[#allocation5 + $0x198] sm:$0xff]  ;;  %v1983_v14 = vld [vmem:[#allocation5 + $0x1d0] sm:$0xff]  ;;  %370 = vmatpush.msra.mxu2 %v1977_v12  ;;  %v1987_v15 = vld [vmem:[#allocation5 + $0x160] sm:$0xff] }
  0x4a   : > { %332 = vmatpush.msra.mxu0 %v1964_v7  ;;  %352 = vmatpush.msra.mxu1 %v1966_v8  ;;  %v1989_v16 = vld [vmem:[#allocation5 + $0x168] sm:$0xff]  ;;  %v1993_v17 = vld [vmem:[#allocation5 + $0x178] sm:$0xff]  ;;  %v1995_v18 = vld [vmem:[#allocation5 + $0x1b0] sm:$0xff] }
  0x4b   : > { %392 = vmatpush.msra.mxu3 %v1970_v9  ;;  %371 = vmatpush.msra.mxu2 %v1983_v14  ;;  %v1999_v19 = vld [vmem:[#allocation5 + $0x140] sm:$0xff]  ;;  %v2001_v20 = vld [vmem:[#allocation5 + $0x148] sm:$0xff]  ;;  %v2005_v21 = vld [vmem:[#allocation5 + $0x158] sm:$0xff] }
  0x4c   : > { %333 = vmatpush.msra.mxu0 %v1973_v10  ;;  %353 = vmatpush.msra.mxu1 %v1975_v11  ;;  %v2007_v22 = vld [vmem:[#allocation5 + $0x190] sm:$0xff]  ;;  %v2011_v23 = vld [vmem:[#allocation5 + $0x120] sm:$0xff]  ;;  %v2013_v24 = vld [vmem:[#allocation5 + $0x128] sm:$0xff] }
  0x4d   : > { %393 = vmatpush.msra.mxu3 %v1981_v13  ;;  %372 = vmatpush.msra.mxu2 %v1995_v18  ;;  %v2017_v25 = vld [vmem:[#allocation5 + $0x138] sm:$0xff]  ;;  %v2019_v26 = vld [vmem:[#allocation5 + $0x170] sm:$0xff]  ;;  %v2023_v27 = vld [vmem:[#allocation5 + $0x100] sm:$0xff] }
  0x4e   : > { %334 = vmatpush.msra.mxu0 %v1987_v15  ;;  %354 = vmatpush.msra.mxu1 %v1989_v16  ;;  %v2025_v28 = vld [vmem:[#allocation5 + $0x108] sm:$0xff]  ;;  %v2029_v29 = vld [vmem:[#allocation5 + $0x118] sm:$0xff]  ;;  %v2031_v30 = vld [vmem:[#allocation5 + $0x150] sm:$0xff] }
  0x4f   : > { %394 = vmatpush.msra.mxu3 %v1993_v17  ;;  %373 = vmatpush.msra.mxu2 %v2007_v22  ;;  %v2035_v31 = vld [vmem:[#allocation5 + $0xe0] sm:$0xff]  ;;  %v2037_v32 = vld [vmem:[#allocation5 + $0xe8] sm:$0xff]  ;;  %v2041_v33 = vld [vmem:[#allocation5 + $0xf8] sm:$0xff] }
  0x50   : > { %335 = vmatpush.msra.mxu0 %v1999_v19  ;;  %355 = vmatpush.msra.mxu1 %v2001_v20  ;;  %v2043_v34 = vld [vmem:[#allocation5 + $0x130] sm:$0xff]  ;;  %v2047_v35 = vld [vmem:[#allocation5 + $0xc0] sm:$0xff]  ;;  %v2049_v36 = vld [vmem:[#allocation5 + $0xc8] sm:$0xff] }
  0x51   : > { %395 = vmatpush.msra.mxu3 %v2005_v21  ;;  %374 = vmatpush.msra.mxu2 %v2019_v26  ;;  %v2053_v37 = vld [vmem:[#allocation5 + $0xd8] sm:$0xff]  ;;  %v2055_v38 = vld [vmem:[#allocation5 + $0x110] sm:$0xff]  ;;  %v2059_v39 = vld [vmem:[#allocation5 + $0xa0] sm:$0xff] }
  0x52   : > { %336 = vmatpush.msra.mxu0 %v2011_v23  ;;  %356 = vmatpush.msra.mxu1 %v2013_v24  ;;  %2840 = vst [vmem:[#allocation27_spill] sm:$0xff] %v2053_v37  ;;  %v2061_v40 = vld [vmem:[#allocation5 + $0xa8] sm:$0xff]  ;;  %v2065_v41 = vld [vmem:[#allocation5 + $0xb8] sm:$0xff]  ;;  %v2067_v42 = vld [vmem:[#allocation5 + $0xf0] sm:$0xff] }
  0x53   : > { %396 = vmatpush.msra.mxu3 %v2017_v25  ;;  %375 = vmatpush.msra.mxu2 %v2031_v30  ;;  %2841 = vst [vmem:[#allocation28_spill] sm:$0xff] %v2059_v39  ;;  %v2071_v43 = vld [vmem:[#allocation5 + $0x80] sm:$0xff]  ;;  %v2073_v44 = vld [vmem:[#allocation5 + $0x88] sm:$0xff]  ;;  %v2077_v45 = vld [vmem:[#allocation5 + $0x98] sm:$0xff] }
  0x54   : > { %337 = vmatpush.msra.mxu0 %v2023_v27  ;;  %357 = vmatpush.msra.mxu1 %v2025_v28  ;;  %2842 = vst [vmem:[#allocation29_spill] sm:$0xff] %v2061_v40  ;;  %v2079_v46 = vld [vmem:[#allocation5 + $0xd0] sm:$0xff]  ;;  %v2083_v47 = vld [vmem:[#allocation5 + $0x60] sm:$0xff]  ;;  %v2085_v48 = vld [vmem:[#allocation5 + $0x68] sm:$0xff] }
  0x55   : > { %397 = vmatpush.msra.mxu3 %v2029_v29  ;;  %376 = vmatpush.msra.mxu2 %v2043_v34  ;;  %2843 = vst [vmem:[#allocation30_spill] sm:$0xff] %v2065_v41  ;;  %v2089_v49 = vld [vmem:[#allocation5 + $0x78] sm:$0xff]  ;;  %v2091_v50 = vld [vmem:[#allocation5 + $0xb0] sm:$0xff]  ;;  %v2095_v51 = vld [vmem:[#allocation5 + $0x40] sm:$0xff] }
  0x56   : > { %338 = vmatpush.msra.mxu0 %v2035_v31  ;;  %358 = vmatpush.msra.mxu1 %v2037_v32  ;;  %2844 = vst [vmem:[#allocation31_spill] sm:$0xff] %v2071_v43  ;;  %v2097_v52 = vld [vmem:[#allocation5 + $0x48] sm:$0xff]  ;;  %v2101_v53 = vld [vmem:[#allocation5 + $0x58] sm:$0xff]  ;;  %v2103_v54 = vld [vmem:[#allocation5 + $0x90] sm:$0xff] }
  0x57   : > { %398 = vmatpush.msra.mxu3 %v2041_v33  ;;  %377 = vmatpush.msra.mxu2 %v2055_v38  ;;  %2845 = vst [vmem:[#allocation32_spill] sm:$0xff] %v2073_v44  ;;  %v2107_v55 = vld [vmem:[#allocation5 + $0x20] sm:$0xff]  ;;  %v2109_v56 = vld [vmem:[#allocation5 + $0x28] sm:$0xff]  ;;  %v2113_v57 = vld [vmem:[#allocation5 + $0x38] sm:$0xff] }
  0x58   : > { %339 = vmatpush.msra.mxu0 %v2047_v35  ;;  %359 = vmatpush.msra.mxu1 %v2049_v36  ;;  %2846 = vst [vmem:[#allocation33_spill] sm:$0xff] %v2077_v45  ;;  %v2115_v58 = vld [vmem:[#allocation5 + $0x70] sm:$0xff]  ;;  %v2119_v59 = vld [vmem:[#allocation5] sm:$0xff]  ;;  %v2121_v60 = vld [vmem:[#allocation5 + $0x8] sm:$0xff] }
  0x59   : > { %399 = vmatpush.msra.mxu3 %v2053_v37  ;;  %2847 = vst [vmem:[#allocation34_spill] sm:$0xff] %v2079_v46  ;;  %378 = vmatpush.msra.mxu2 %v2067_v42  ;;  %v2125_v61 = vld [vmem:[#allocation5 + $0x18] sm:$0xff]  ;;  %v2127_v62 = vld [vmem:[#allocation4 + $0x1e0] sm:$0xff]  ;;  %v2131_v63 = vld [vmem:[#allocation4 + $0x1e8] sm:$0xff] }
  0x5a   : > { %340 = vmatpush.msra.mxu0 %v2059_v39  ;;  %360 = vmatpush.msra.mxu1 %v2061_v40  ;;  %2848 = vst [vmem:[#allocation35_spill] sm:$0xff] %v2083_v47  ;;  %v2133_v0 = vld [vmem:[#allocation4 + $0x1f8] sm:$0xff] }
  0x5b   : > { %400 = vmatpush.msra.mxu3 %v2065_v41  ;;  %2849 = vst [vmem:[#allocation36_spill] sm:$0xff] %v2085_v48  ;;  %379 = vmatpush.msra.mxu2 %v2079_v46 }
  0x5c   : > { %341 = vmatpush.msra.mxu0 %v2071_v43  ;;  %361 = vmatpush.msra.mxu1 %v2073_v44  ;;  %2850 = vst [vmem:[#allocation37_spill] sm:$0xff] %v2089_v49 }
  0x5d   : > { %2851 = vst [vmem:[#allocation38_spill] sm:$0xff] %v2091_v50  ;;  %401 = vmatpush.msra.mxu3 %v2077_v45  ;;  %380 = vmatpush.msra.mxu2 %v2091_v50 }
  0x5e   : > { %2852 = vst [vmem:[#allocation39_spill] sm:$0xff] %v2095_v51  ;;  %342 = vmatpush.msra.mxu0 %v2083_v47  ;;  %362 = vmatpush.msra.mxu1 %v2085_v48 }
  0x5f   : > { %2853 = vst [vmem:[#allocation40_spill] sm:$0xff] %v2097_v52  ;;  %402 = vmatpush.msra.mxu3 %v2089_v49  ;;  %381 = vmatpush.msra.mxu2 %v2103_v54 }
  0x60   : > { %2854 = vst [vmem:[#allocation41_spill] sm:$0xff] %v2101_v53  ;;  %343 = vmatpush.msra.mxu0 %v2095_v51  ;;  %363 = vmatpush.msra.mxu1 %v2097_v52 }
  0x61   : > { %2855 = vst [vmem:[#allocation42_spill] sm:$0xff] %v2103_v54  ;;  %403 = vmatpush.msra.mxu3 %v2101_v53  ;;  %382 = vmatpush.msra.mxu2 %v2115_v58  ;;  %v2137_v54 = vld [vmem:[#allocation5 + $0x50] sm:$0xff]  ;;  %v2314_v53 = vld [vmem:[#allocation4 + $0x18] sm:$0xff] }
  0x62   : > { %2856 = vst [vmem:[#allocation43_spill] sm:$0xff] %v2107_v55  ;;  %344 = vmatpush.msra.mxu0 %v2107_v55  ;;  %364 = vmatpush.msra.mxu1 %v2109_v56  ;;  %v2139_v55 = vld [vmem:[#allocation4 + $0x1c0] sm:$0xff] }
  0x63   : > { %2857 = vst [vmem:[#allocation44_spill] sm:$0xff] %v2109_v56  ;;  %404 = vmatpush.msra.mxu3 %v2113_v57  ;;  %v2143_v56 = vld [vmem:[#allocation4 + $0x1c8] sm:$0xff]  ;;  %383 = vmatpush.msra.mxu2 %v2137_v54 }
  0x64   : > { %2858 = vst [vmem:[#allocation45_spill] sm:$0xff] %v2113_v57  ;;  %345 = vmatpush.msra.mxu0 %v2119_v59  ;;  %365 = vmatpush.msra.mxu1 %v2121_v60  ;;  %v2145_v57 = vld [vmem:[#allocation4 + $0x1d8] sm:$0xff] }
  0x65   : > { %2859 = vst [vmem:[#allocation46_spill] sm:$0xff] %v2115_v58  ;;  %405 = vmatpush.msra.mxu3 %v2125_v61  ;;  %v2149_v58 = vld [vmem:[#allocation5 + $0x30] sm:$0xff] }
  0x66   : > { %2860 = vst [vmem:[#allocation47_spill] sm:$0xff] %v2119_v59  ;;  %410 = vmatpush.msrb.mxu0 %v2127_v62  ;;  %430 = vmatpush.msrb.mxu1 %v2131_v63  ;;  %v2151_v59 = vld [vmem:[#allocation4 + $0x1a0] sm:$0xff] }
  0x67   : > { %2861 = vst [vmem:[#allocation48_spill] sm:$0xff] %v2121_v60  ;;  %470 = vmatpush.msrb.mxu3 %v2133_v0  ;;  %v2155_v60 = vld [vmem:[#allocation4 + $0x1a8] sm:$0xff]  ;;  %384 = vmatpush.msra.mxu2 %v2149_v58 }
  0x68   : > { %2862 = vst [vmem:[#allocation49_spill] sm:$0xff] %v2125_v61  ;;  %411 = vmatpush.msrb.mxu0 %v2139_v55  ;;  %v2157_v61 = vld [vmem:[#allocation4 + $0x1b8] sm:$0xff]  ;;  %431 = vmatpush.msrb.mxu1 %v2143_v56 }
  0x69   : > { %2863 = vst [vmem:[#allocation50_spill] sm:$0xff] %v2127_v62  ;;  %471 = vmatpush.msrb.mxu3 %v2145_v57  ;;  %v2161_v62 = vld [vmem:[#allocation5 + $0x10] sm:$0xff] }
  0x6a   : > { %2864 = vst [vmem:[#allocation51_spill] sm:$0xff] %v2131_v63  ;;  %v2163_v63 = vld [vmem:[#allocation4 + $0x180] sm:$0xff]  ;;  %412 = vmatpush.msrb.mxu0 %v2151_v59  ;;  %432 = vmatpush.msrb.mxu1 %v2155_v60 }
  0x6b   : > { %2865 = vst [vmem:[#allocation52_spill] sm:$0xff] %v2133_v0  ;;  %v2167_v0 = vld [vmem:[#allocation4 + $0x188] sm:$0xff]  ;;  %472 = vmatpush.msrb.mxu3 %v2157_v61  ;;  %385 = vmatpush.msra.mxu2 %v2161_v62 }
  0x6c   : > { %2866 = vst [vmem:[#allocation53_spill] sm:$0xff] %v2137_v54  ;;  %v2169_v54 = vld [vmem:[#allocation4 + $0x198] sm:$0xff]  ;;  %413 = vmatpush.msrb.mxu0 %v2163_v63  ;;  %433 = vmatpush.msrb.mxu1 %v2167_v0 }
  0x6d   : > { %2867 = vst [vmem:[#allocation54_spill] sm:$0xff] %v2139_v55  ;;  %v2173_v55 = vld [vmem:[#allocation4 + $0x1f0] sm:$0xff]  ;;  %473 = vmatpush.msrb.mxu3 %v2169_v54 }
  0x6e   : > { %2868 = vst [vmem:[#allocation55_spill] sm:$0xff] %v2143_v56  ;;  %v2175_v56 = vld [vmem:[#allocation4 + $0x160] sm:$0xff]  ;;  %450 = vmatpush.msrb.mxu2 %v2173_v55 }
  0x6f   : > { %2869 = vst [vmem:[#allocation56_spill] sm:$0xff] %v2145_v57  ;;  %v2179_v57 = vld [vmem:[#allocation4 + $0x168] sm:$0xff]  ;;  %414 = vmatpush.msrb.mxu0 %v2175_v56 }
  0x70   : > { %2870 = vst [vmem:[#allocation57_spill] sm:$0xff] %v2149_v58  ;;  %v2181_v58 = vld [vmem:[#allocation4 + $0x178] sm:$0xff]  ;;  %434 = vmatpush.msrb.mxu1 %v2179_v57 }
  0x71   : > { %2871 = vst [vmem:[#allocation58_spill] sm:$0xff] %v2151_v59  ;;  %v2185_v59 = vld [vmem:[#allocation4 + $0x1d0] sm:$0xff]  ;;  %474 = vmatpush.msrb.mxu3 %v2181_v58 }
  0x72   : > { %2872 = vst [vmem:[#allocation59_spill] sm:$0xff] %v2155_v60  ;;  %v2187_v60 = vld [vmem:[#allocation4 + $0x140] sm:$0xff]  ;;  %451 = vmatpush.msrb.mxu2 %v2185_v59 }
  0x73   : > { %2873 = vst [vmem:[#allocation60_spill] sm:$0xff] %v2157_v61  ;;  %v2191_v61 = vld [vmem:[#allocation4 + $0x148] sm:$0xff]  ;;  %415 = vmatpush.msrb.mxu0 %v2187_v60 }
  0x74   : > { %2874 = vst [vmem:[#allocation61_spill] sm:$0xff] %v2161_v62  ;;  %v2193_v62 = vld [vmem:[#allocation4 + $0x158] sm:$0xff]  ;;  %435 = vmatpush.msrb.mxu1 %v2191_v61 }
  0x75   : > { %2875 = vst [vmem:[#allocation62_spill] sm:$0xff] %v2163_v63  ;;  %v2197_v63 = vld [vmem:[#allocation4 + $0x1b0] sm:$0xff]  ;;  %475 = vmatpush.msrb.mxu3 %v2193_v62 }
  0x76   : > { %2876 = vst [vmem:[#allocation63_spill] sm:$0xff] %v2167_v0  ;;  %v2199_v0 = vld [vmem:[#allocation4 + $0x120] sm:$0xff]  ;;  %452 = vmatpush.msrb.mxu2 %v2197_v63 }
  0x77   : > { %2877 = vst [vmem:[#allocation64_spill] sm:$0xff] %v2169_v54  ;;  %v2203_v54 = vld [vmem:[#allocation4 + $0x128] sm:$0xff]  ;;  %416 = vmatpush.msrb.mxu0 %v2199_v0 }
  0x78   : > { %2878 = vst [vmem:[#allocation65_spill] sm:$0xff] %v2173_v55  ;;  %v2205_v55 = vld [vmem:[#allocation4 + $0x138] sm:$0xff]  ;;  %436 = vmatpush.msrb.mxu1 %v2203_v54 }
  0x79   : > { %2879 = vst [vmem:[#allocation66_spill] sm:$0xff] %v2175_v56  ;;  %v2209_v56 = vld [vmem:[#allocation4 + $0x190] sm:$0xff]  ;;  %476 = vmatpush.msrb.mxu3 %v2205_v55 }
  0x7a   : > { %2880 = vst [vmem:[#allocation67_spill] sm:$0xff] %v2179_v57  ;;  %v2211_v57 = vld [vmem:[#allocation4 + $0x100] sm:$0xff]  ;;  %453 = vmatpush.msrb.mxu2 %v2209_v56 }
  0x7b   : > { %2881 = vst [vmem:[#allocation68_spill] sm:$0xff] %v2181_v58  ;;  %v2215_v58 = vld [vmem:[#allocation4 + $0x108] sm:$0xff]  ;;  %417 = vmatpush.msrb.mxu0 %v2211_v57 }
  0x7c   : > { %2882 = vst [vmem:[#allocation69_spill] sm:$0xff] %v2185_v59  ;;  %v2217_v59 = vld [vmem:[#allocation4 + $0x118] sm:$0xff]  ;;  %437 = vmatpush.msrb.mxu1 %v2215_v58 }
  0x7d   : > { %2883 = vst [vmem:[#allocation70_spill] sm:$0xff] %v2187_v60  ;;  %v2221_v60 = vld [vmem:[#allocation4 + $0x170] sm:$0xff]  ;;  %477 = vmatpush.msrb.mxu3 %v2217_v59 }
  0x7e   : > { %2884 = vst [vmem:[#allocation71_spill] sm:$0xff] %v2191_v61  ;;  %v2223_v61 = vld [vmem:[#allocation4 + $0xe0] sm:$0xff]  ;;  %454 = vmatpush.msrb.mxu2 %v2221_v60 }
  0x7f   : > { %2885 = vst [vmem:[#allocation72_spill] sm:$0xff] %v2193_v62  ;;  %v2227_v62 = vld [vmem:[#allocation4 + $0xe8] sm:$0xff]  ;;  %418 = vmatpush.msrb.mxu0 %v2223_v61 }
  0x80   : > { %2886 = vst [vmem:[#allocation73_spill] sm:$0xff] %v2197_v63  ;;  %v2229_v63 = vld [vmem:[#allocation4 + $0xf8] sm:$0xff]  ;;  %438 = vmatpush.msrb.mxu1 %v2227_v62 }
  0x81   : > { %2887 = vst [vmem:[#allocation74_spill] sm:$0xff] %v2199_v0  ;;  %v2233_v0 = vld [vmem:[#allocation4 + $0x150] sm:$0xff]  ;;  %478 = vmatpush.msrb.mxu3 %v2229_v63 }
  0x82   : > { %2888 = vst [vmem:[#allocation75_spill] sm:$0xff] %v2203_v54  ;;  %v2235_v54 = vld [vmem:[#allocation4 + $0xc0] sm:$0xff]  ;;  %455 = vmatpush.msrb.mxu2 %v2233_v0 }
  0x83   : > { %2889 = vst [vmem:[#allocation76_spill] sm:$0xff] %v2205_v55  ;;  %v2239_v55 = vld [vmem:[#allocation4 + $0xc8] sm:$0xff]  ;;  %419 = vmatpush.msrb.mxu0 %v2235_v54 }
  0x84   : > { %2890 = vst [vmem:[#allocation77_spill] sm:$0xff] %v2209_v56  ;;  %v2241_v56 = vld [vmem:[#allocation4 + $0xd8] sm:$0xff]  ;;  %439 = vmatpush.msrb.mxu1 %v2239_v55 }
  0x85   : > { %2891 = vst [vmem:[#allocation78_spill] sm:$0xff] %v2211_v57  ;;  %v2245_v57 = vld [vmem:[#allocation4 + $0x130] sm:$0xff]  ;;  %479 = vmatpush.msrb.mxu3 %v2241_v56 }
  0x86   : > { %2892 = vst [vmem:[#allocation79_spill] sm:$0xff] %v2215_v58  ;;  %v2247_v58 = vld [vmem:[#allocation4 + $0xa0] sm:$0xff]  ;;  %456 = vmatpush.msrb.mxu2 %v2245_v57 }
  0x87   : > { %2893 = vst [vmem:[#allocation80_spill] sm:$0xff] %v2217_v59  ;;  %v2251_v59 = vld [vmem:[#allocation4 + $0xa8] sm:$0xff]  ;;  %420 = vmatpush.msrb.mxu0 %v2247_v58 }
  0x88   : > { %2894 = vst [vmem:[#allocation81_spill] sm:$0xff] %v2221_v60  ;;  %v2253_v60 = vld [vmem:[#allocation4 + $0xb8] sm:$0xff]  ;;  %440 = vmatpush.msrb.mxu1 %v2251_v59 }
  0x89   : > { %2895 = vst [vmem:[#allocation82_spill] sm:$0xff] %v2223_v61  ;;  %v2257_v61 = vld [vmem:[#allocation4 + $0x110] sm:$0xff]  ;;  %480 = vmatpush.msrb.mxu3 %v2253_v60 }
  0x8a   : > { %2896 = vst [vmem:[#allocation83_spill] sm:$0xff] %v2227_v62  ;;  %v2259_v62 = vld [vmem:[#allocation4 + $0x80] sm:$0xff]  ;;  %457 = vmatpush.msrb.mxu2 %v2257_v61 }
  0x8b   : > { %2897 = vst [vmem:[#allocation84_spill] sm:$0xff] %v2229_v63  ;;  %v2263_v63 = vld [vmem:[#allocation4 + $0x88] sm:$0xff]  ;;  %421 = vmatpush.msrb.mxu0 %v2259_v62 }
  0x8c   : > { %2898 = vst [vmem:[#allocation85_spill] sm:$0xff] %v2233_v0  ;;  %v2265_v0 = vld [vmem:[#allocation4 + $0x98] sm:$0xff]  ;;  %441 = vmatpush.msrb.mxu1 %v2263_v63 }
  0x8d   : > { %2899 = vst [vmem:[#allocation86_spill] sm:$0xff] %v2235_v54  ;;  %v327_v54 = vld [vmem:[#allocation2] sm:$0xff]  ;;  %481 = vmatpush.msrb.mxu3 %v2265_v0 }
  0x8e   : > { %2900 = vst [vmem:[#allocation87_spill] sm:$0xff] %v2239_v55  ;;  %v2277_v55 = vld [vmem:[#allocation4 + $0x68] sm:$0xff]  ;;  %346 = vmatmul.f32.vlgmr.msra.gmra.mxu0 %v327_v54  ;;  %366 = vmatmul.f32.vlgmr.msra.gmra.mxu1 %v327_v54 }
  0x8f   : > { %2901 = vst [vmem:[#allocation88_spill] sm:$0xff] %v2241_v56  ;;  %v2271_v56 = vld [vmem:[#allocation4 + $0xf0] sm:$0xff]  ;;  %406 = vmatmul.f32.vlgmr.msra.gmra.mxu3 %v327_v54  ;;  %442 = vmatpush.msrb.mxu1 %v2277_v55 }
  0x90   : > { %2902 = vst [vmem:[#allocation89_spill] sm:$0xff] %v2245_v57  ;;  %458 = vmatpush.msrb.mxu2 %v2271_v56  ;;  %v2296_v57 = vld [vmem:[#allocation4 + $0x20] sm:$0xff] }
  0x91   : > { %2903 = vst [vmem:[#allocation90_spill] sm:$0xff] %v2247_v58  ;;  %v2275_v58 = vld [vmem:[#allocation4 + $0x60] sm:$0xff]  ;;  %386 = vmatmul.f32.vlgmr.msra.gmra.mxu2 %v327_v54  ;;  %v2333_v54 = vld [vmem:[#allocation4 + $0x10] sm:$0xff] }
  0x92   : > { %2904 = vst [vmem:[#allocation91_spill] sm:$0xff] %v2251_v59  ;;  %v2279_v59 = vld [vmem:[#allocation4 + $0x78] sm:$0xff]  ;;  %422 = vmatpush.msrb.mxu0 %v2275_v58 }
  0x93   : > { %2905 = vst [vmem:[#allocation92_spill] sm:$0xff] %v2253_v60  ;;  %v2281_v60 = vld [vmem:[#allocation4 + $0xd0] sm:$0xff]  ;;  %482 = vmatpush.msrb.mxu3 %v2279_v59 }
  0x94   : > { %2906 = vst [vmem:[#allocation93_spill] sm:$0xff] %v2257_v61  ;;  %v2286_v61 = vld [vmem:[#allocation4 + $0x48] sm:$0xff]  ;;  %459 = vmatpush.msrb.mxu2 %v2281_v60 }
  0x95   : > { %2907 = vst [vmem:[#allocation94_spill] sm:$0xff] %v2259_v62  ;;  %v2284_v62 = vld [vmem:[#allocation4 + $0x40] sm:$0xff]  ;;  %443 = vmatpush.msrb.mxu1 %v2286_v61 }
  0x96   : > { %2908 = vst [vmem:[#allocation95_spill] sm:$0xff] %v2263_v63  ;;  %v2292_v63 = vld [vmem:[#allocation4 + $0xb0] sm:$0xff]  ;;  %423 = vmatpush.msrb.mxu0 %v2284_v62 }
  0x97   : > { %2909 = vst [vmem:[#allocation96_spill] sm:$0xff] %v2265_v0  ;;  %v2290_v0 = vld [vmem:[#allocation4 + $0x58] sm:$0xff]  ;;  %460 = vmatpush.msrb.mxu2 %v2292_v63 }
  0x98   : > { %2910 = vst [vmem:[#allocation97_spill] sm:$0xff] %v2271_v56  ;;  %v2298_v56 = vld [vmem:[#allocation4 + $0x28] sm:$0xff]  ;;  %483 = vmatpush.msrb.mxu3 %v2290_v0  ;;  %424 = vmatpush.msrb.mxu0 %v2296_v57 }
  0x99   : > { %2911 = vst [vmem:[#allocation98_spill] sm:$0xff] %v2275_v58  ;;  %v2302_v58 = vld [vmem:[#allocation4 + $0x38] sm:$0xff]  ;;  %444 = vmatpush.msrb.mxu1 %v2298_v56 }
  0x9a   : > { %2912 = vst [vmem:[#allocation99_spill] sm:$0xff] %v2277_v55  ;;  %v2304_v55 = vld [vmem:[#allocation4 + $0x90] sm:$0xff]  ;;  %484 = vmatpush.msrb.mxu3 %v2302_v58 }
  0x9b   : > { %2913 = vst [vmem:[#allocation100_spill] sm:$0xff] %v2279_v59  ;;  %v2308_v59 = vld [vmem:[#allocation4] sm:$0xff]  ;;  %461 = vmatpush.msrb.mxu2 %v2304_v55 }
  0x9c   : > { %2914 = vst [vmem:[#allocation101_spill] sm:$0xff] %v2281_v60  ;;  %v2312_v60 = vld [vmem:[#allocation4 + $0x8] sm:$0xff]  ;;  %425 = vmatpush.msrb.mxu0 %v2308_v59  ;;  %485 = vmatpush.msrb.mxu3 %v2314_v53 }
  0x9d   : > { %2915 = vst [vmem:[#allocation102_spill] sm:$0xff] %v2284_v62  ;;  %445 = vmatpush.msrb.mxu1 %v2312_v60 }
  0x9e   : > { %2916 = vst [vmem:[#allocation103_spill] sm:$0xff] %v2286_v61  ;;  %v329_v61 = vld [vmem:[%s1931_s14] sm:$0xff]  ;;  %569 = vmatpush.msra.mxu0 %v1949_v1  ;;  %629 = vmatpush.msra.mxu3 %v1953_v3 }
  0x9f   : > { %2917 = vst [vmem:[#allocation104_spill] sm:$0xff] %v2290_v0  ;;  %v2320_v0 = vld [vmem:[#allocation4 + $0x70] sm:$0xff]  ;;  %426 = vmatmul.f32.vlgmr.msrb.gmra.mxu0 %v329_v61  ;;  %446 = vmatmul.f32.vlgmr.msrb.gmra.mxu1 %v329_v61 }
  0xa0   : > { %2918 = vst [vmem:[#allocation105_spill] sm:$0xff] %v2292_v63  ;;  %462 = vmatpush.msrb.mxu2 %v2320_v0  ;;  %486 = vmatmul.f32.vlgmr.msrb.gmra.mxu3 %v329_v61 }
  0xa1   : > { %2919 = vst [vmem:[#allocation106_spill] sm:$0xff] %v2296_v57  ;;  %589 = vmatpush.msra.mxu1 %v1951_v2  ;;  %570 = vmatpush.msra.mxu0 %v1957_v4 }
  0xa2   : > { %2920 = vst [vmem:[#allocation107_spill] sm:$0xff] %v2298_v56  ;;  %v2324_v56 = vld [vmem:[#allocation4 + $0x50] sm:$0xff]  ;;  %630 = vmatpush.msra.mxu3 %v1961_v6 }
  0xa3   : > { %2921 = vst [vmem:[#allocation108_spill] sm:$0xff] %v2302_v58  ;;  %v2327_v58 = vld [vmem:[#allocation4 + $0x30] sm:$0xff]  ;;  %463 = vmatpush.msrb.mxu2 %v2324_v56  ;;  %590 = vmatpush.msra.mxu1 %v1959_v5 }
  0xa4   : > { %2922 = vst [vmem:[#allocation109_spill] sm:$0xff] %v2304_v55  ;;  %571 = vmatpush.msra.mxu0 %v1964_v7  ;;  %631 = vmatpush.msra.mxu3 %v1970_v9 }
  0xa5   : > { %2923 = vst [vmem:[#allocation110_spill] sm:$0xff] %v2308_v59  ;;  %464 = vmatpush.msrb.mxu2 %v2327_v58  ;;  %591 = vmatpush.msra.mxu1 %v1966_v8 }
  0xa6   : > { %2924 = vst [vmem:[#allocation111_spill] sm:$0xff] %v2312_v60  ;;  %572 = vmatpush.msra.mxu0 %v1973_v10  ;;  %632 = vmatpush.msra.mxu3 %v1981_v13 }
  0xa7   : > { %2925 = vst [vmem:[#allocation112_spill] sm:$0xff] %v2314_v53  ;;  %465 = vmatpush.msrb.mxu2 %v2333_v54  ;;  %592 = vmatpush.msra.mxu1 %v1975_v11 }
  0xa8   : > { %2926 = vst [vmem:[#allocation113_spill] sm:$0xff] %v2320_v0  ;;  %466 = vmatmul.f32.vlgmr.msrb.gmra.mxu2 %v329_v61  ;;  %573 = vmatpush.msra.mxu0 %v1987_v15  ;;  %v2930_v61 = vld [vmem:[#allocation41_spill] sm:$0xff] }
  0xa9   : > { %2927 = vst [vmem:[#allocation114_spill] sm:$0xff] %v2324_v56  ;;  %609 = vmatpush.msra.mxu2 %v1977_v12  ;;  %593 = vmatpush.msra.mxu1 %v1989_v16 }
  0xaa   : > { %2928 = vst [vmem:[#allocation115_spill] sm:$0xff] %v2327_v58  ;;  %633 = vmatpush.msra.mxu3 %v1993_v17  ;;  %574 = vmatpush.msra.mxu0 %v1999_v19 }
  0xab   : > { %2929 = vst [vmem:[#allocation116_spill] sm:$0xff] %v2333_v54  ;;  %610 = vmatpush.msra.mxu2 %v1983_v14  ;;  %594 = vmatpush.msra.mxu1 %v2001_v20 }
  0xac   : > { %634 = vmatpush.msra.mxu3 %v2005_v21  ;;  %575 = vmatpush.msra.mxu0 %v2011_v23 }
  0xad   : > { %611 = vmatpush.msra.mxu2 %v1995_v18  ;;  %595 = vmatpush.msra.mxu1 %v2013_v24 }
  0xae   : > { %635 = vmatpush.msra.mxu3 %v2017_v25  ;;  %576 = vmatpush.msra.mxu0 %v2023_v27 }
  0xaf   : > { %612 = vmatpush.msra.mxu2 %v2007_v22  ;;  %596 = vmatpush.msra.mxu1 %v2025_v28 }
  0xb0   : > { %636 = vmatpush.msra.mxu3 %v2029_v29  ;;  %577 = vmatpush.msra.mxu0 %v2035_v31 }
  0xb1   : > { %613 = vmatpush.msra.mxu2 %v2019_v26  ;;  %597 = vmatpush.msra.mxu1 %v2037_v32 }
  0xb2   : > { %637 = vmatpush.msra.mxu3 %v2041_v33  ;;  %578 = vmatpush.msra.mxu0 %v2047_v35 }
  0xb3   : > { %614 = vmatpush.msra.mxu2 %v2031_v30  ;;  %598 = vmatpush.msra.mxu1 %v2049_v36 }
  0xb4   : > { %638 = vmatpush.msra.mxu3 %v2053_v37  ;;  %579 = vmatpush.msra.mxu0 %v2059_v39 }
  0xb5   : > { %615 = vmatpush.msra.mxu2 %v2043_v34  ;;  %599 = vmatpush.msra.mxu1 %v2061_v40 }
  0xb6   : > { %639 = vmatpush.msra.mxu3 %v2065_v41  ;;  %580 = vmatpush.msra.mxu0 %v2071_v43  ;;  %v2931_v43 = vld [vmem:[#allocation43_spill] sm:$0xff] }
  0xb7   : > { %616 = vmatpush.msra.mxu2 %v2055_v38  ;;  %600 = vmatpush.msra.mxu1 %v2073_v44  ;;  %v2932_v44 = vld [vmem:[#allocation42_spill] sm:$0xff]  ;;  %v2935_v41 = vld [vmem:[#allocation47_spill] sm:$0xff] }
  0xb8   : > { %640 = vmatpush.msra.mxu3 %v2077_v45  ;;  %581 = vmatpush.msra.mxu0 %v2083_v47  ;;  %v2933_v45 = vld [vmem:[#allocation44_spill] sm:$0xff]  ;;  %v2934_v47 = vld [vmem:[#allocation45_spill] sm:$0xff] }
  0xb9   : > { %617 = vmatpush.msra.mxu2 %v2067_v42  ;;  %601 = vmatpush.msra.mxu1 %v2085_v48  ;;  %v2936_v48 = vld [vmem:[#allocation46_spill] sm:$0xff] }
  0xba   : > { %641 = vmatpush.msra.mxu3 %v2089_v49  ;;  %582 = vmatpush.msra.mxu0 %v2095_v51  ;;  %v2937_v49 = vld [vmem:[#allocation48_spill] sm:$0xff]  ;;  %v2938_v51 = vld [vmem:[#allocation49_spill] sm:$0xff] }
  0xbb   : > { %618 = vmatpush.msra.mxu2 %v2079_v46  ;;  %602 = vmatpush.msra.mxu1 %v2097_v52  ;;  %v2940_v52 = vld [vmem:[#allocation53_spill] sm:$0xff] }
  0xbc   : > { %642 = vmatpush.msra.mxu3 %v2930_v61  ;;  %583 = vmatpush.msra.mxu0 %v2931_v43  ;;  %v2941_v61 = vld [vmem:[#allocation51_spill] sm:$0xff]  ;;  %v2942_v43 = vld [vmem:[#allocation52_spill] sm:$0xff] }
  0xbd   : > { %619 = vmatpush.msra.mxu2 %v2091_v50  ;;  %603 = vmatpush.msra.mxu1 %v2933_v45  ;;  %v2939_v50 = vld [vmem:[#allocation50_spill] sm:$0xff]  ;;  %v2944_v45 = vld [vmem:[#allocation57_spill] sm:$0xff] }
  0xbe   : > { %643 = vmatpush.msra.mxu3 %v2934_v47  ;;  %584 = vmatpush.msra.mxu0 %v2935_v41  ;;  %v2945_v47 = vld [vmem:[#allocation55_spill] sm:$0xff]  ;;  %v2946_v41 = vld [vmem:[#allocation56_spill] sm:$0xff] }
  0xbf   : > { %620 = vmatpush.msra.mxu2 %v2932_v44  ;;  %604 = vmatpush.msra.mxu1 %v2937_v49  ;;  %v2943_v44 = vld [vmem:[#allocation54_spill] sm:$0xff]  ;;  %v2948_v49 = vld [vmem:[#allocation61_spill] sm:$0xff] }
  0xc0   : > { %644 = vmatpush.msra.mxu3 %v2938_v51  ;;  %649 = vmatpush.msrb.mxu0 %v2939_v50  ;;  %v2949_v51 = vld [vmem:[#allocation59_spill] sm:$0xff]  ;;  %v2950_v50 = vld [vmem:[#allocation65_spill] sm:$0xff] }
  0xc1   : > { %621 = vmatpush.msra.mxu2 %v2936_v48  ;;  %669 = vmatpush.msrb.mxu1 %v2941_v61  ;;  %v2947_v48 = vld [vmem:[#allocation58_spill] sm:$0xff] }
  0xc2   : > { %709 = vmatpush.msrb.mxu3 %v2942_v43  ;;  %650 = vmatpush.msrb.mxu0 %v2943_v44  ;;  %v2952_v61 = vld [vmem:[#allocation62_spill] sm:$0xff]  ;;  %v2953_v43 = vld [vmem:[#allocation63_spill] sm:$0xff]  ;;  %v2954_v44 = vld [vmem:[#allocation69_spill] sm:$0xff] }
  0xc3   : > { %622 = vmatpush.msra.mxu2 %v2940_v52  ;;  %670 = vmatpush.msrb.mxu1 %v2945_v47  ;;  %v2951_v52 = vld [vmem:[#allocation60_spill] sm:$0xff]  ;;  %v2956_v47 = vld [vmem:[#allocation66_spill] sm:$0xff] }
  0xc4   : > { %710 = vmatpush.msrb.mxu3 %v2946_v41  ;;  %651 = vmatpush.msrb.mxu0 %v2947_v48  ;;  %v2957_v41 = vld [vmem:[#allocation67_spill] sm:$0xff]  ;;  %v2958_v48 = vld [vmem:[#allocation73_spill] sm:$0xff] }
  0xc5   : > { %623 = vmatpush.msra.mxu2 %v2944_v45  ;;  %671 = vmatpush.msrb.mxu1 %v2949_v51  ;;  %v2955_v45 = vld [vmem:[#allocation64_spill] sm:$0xff]  ;;  %v2960_v51 = vld [vmem:[#allocation70_spill] sm:$0xff] }
  0xc6   : > { %711 = vmatpush.msrb.mxu3 %v2951_v52  ;;  %652 = vmatpush.msrb.mxu0 %v2952_v61  ;;  %v2962_v52 = vld [vmem:[#allocation77_spill] sm:$0xff]  ;;  %v2963_v61 = vld [vmem:[#allocation72_spill] sm:$0xff] }
  0xc7   : > { %624 = vmatpush.msra.mxu2 %v2948_v49  ;;  %672 = vmatpush.msrb.mxu1 %v2953_v43  ;;  %v2959_v49 = vld [vmem:[#allocation68_spill] sm:$0xff]  ;;  %v2964_v43 = vld [vmem:[#allocation74_spill] sm:$0xff] }
  0xc8   : > { %712 = vmatpush.msrb.mxu3 %v2955_v45  ;;  %653 = vmatpush.msrb.mxu0 %v2956_v47  ;;  %v2966_v45 = vld [vmem:[#allocation81_spill] sm:$0xff]  ;;  %v2967_v47 = vld [vmem:[#allocation76_spill] sm:$0xff] }
  0xc9   : > { %689 = vmatpush.msrb.mxu2 %v2950_v50  ;;  %673 = vmatpush.msrb.mxu1 %v2957_v41  ;;  %v2961_v50 = vld [vmem:[#allocation71_spill] sm:$0xff]  ;;  %v2968_v41 = vld [vmem:[#allocation78_spill] sm:$0xff] }
  0xca   : > { %713 = vmatpush.msrb.mxu3 %v2959_v49  ;;  %654 = vmatpush.msrb.mxu0 %v2960_v51  ;;  %v2970_v49 = vld [vmem:[#allocation85_spill] sm:$0xff]  ;;  %v2971_v51 = vld [vmem:[#allocation80_spill] sm:$0xff] }
  0xcb   : > { %690 = vmatpush.msrb.mxu2 %v2954_v44  ;;  %674 = vmatpush.msrb.mxu1 %v2961_v50  ;;  %v2965_v44 = vld [vmem:[#allocation75_spill] sm:$0xff]  ;;  %v2972_v50 = vld [vmem:[#allocation82_spill] sm:$0xff] }
  0xcc   : > { %714 = vmatpush.msrb.mxu3 %v2963_v61  ;;  %655 = vmatpush.msrb.mxu0 %v2964_v43  ;;  %v2974_v61 = vld [vmem:[#allocation89_spill] sm:$0xff]  ;;  %v2975_v43 = vld [vmem:[#allocation84_spill] sm:$0xff] }
  0xcd   : > { %691 = vmatpush.msrb.mxu2 %v2958_v48  ;;  %675 = vmatpush.msrb.mxu1 %v2965_v44  ;;  %v2969_v48 = vld [vmem:[#allocation79_spill] sm:$0xff]  ;;  %v2976_v44 = vld [vmem:[#allocation86_spill] sm:$0xff] }
  0xce   : > { %715 = vmatpush.msrb.mxu3 %v2967_v47  ;;  %656 = vmatpush.msrb.mxu0 %v2968_v41  ;;  %v2978_v47 = vld [vmem:[#allocation93_spill] sm:$0xff]  ;;  %v2979_v41 = vld [vmem:[#allocation88_spill] sm:$0xff] }
  0xcf   : > { %692 = vmatpush.msrb.mxu2 %v2962_v52  ;;  %676 = vmatpush.msrb.mxu1 %v2969_v48  ;;  %v2973_v52 = vld [vmem:[#allocation83_spill] sm:$0xff]  ;;  %v2980_v48 = vld [vmem:[#allocation90_spill] sm:$0xff] }
  0xd0   : > { %716 = vmatpush.msrb.mxu3 %v2971_v51  ;;  %657 = vmatpush.msrb.mxu0 %v2972_v50  ;;  %v2982_v51 = vld [vmem:[#allocation97_spill] sm:$0xff]  ;;  %v2983_v50 = vld [vmem:[#allocation92_spill] sm:$0xff] }
  0xd1   : > { %693 = vmatpush.msrb.mxu2 %v2966_v45  ;;  %677 = vmatpush.msrb.mxu1 %v2973_v52  ;;  %v2977_v45 = vld [vmem:[#allocation87_spill] sm:$0xff]  ;;  %v2984_v52 = vld [vmem:[#allocation94_spill] sm:$0xff] }
  0xd2   : > { %717 = vmatpush.msrb.mxu3 %v2975_v43  ;;  %658 = vmatpush.msrb.mxu0 %v2976_v44  ;;  %v2986_v43 = vld [vmem:[#allocation101_spill] sm:$0xff]  ;;  %v2987_v44 = vld [vmem:[#allocation96_spill] sm:$0xff] }
  0xd3   : > { %694 = vmatpush.msrb.mxu2 %v2970_v49  ;;  %678 = vmatpush.msrb.mxu1 %v2977_v45  ;;  %v2981_v49 = vld [vmem:[#allocation91_spill] sm:$0xff]  ;;  %v2988_v45 = vld [vmem:[#allocation98_spill] sm:$0xff] }
  0xd4   : > { %718 = vmatpush.msrb.mxu3 %v2979_v41  ;;  %659 = vmatpush.msrb.mxu0 %v2980_v48  ;;  %v2990_v48 = vld [vmem:[#allocation100_spill] sm:$0xff] }
  0xd5   : > { %695 = vmatpush.msrb.mxu2 %v2974_v61  ;;  %679 = vmatpush.msrb.mxu1 %v2981_v49  ;;  %v2985_v61 = vld [vmem:[#allocation95_spill] sm:$0xff] }
  0xd6   : > { %719 = vmatpush.msrb.mxu3 %v2983_v50  ;;  %660 = vmatpush.msrb.mxu0 %v2984_v52  ;;  %v2991_v49 = vld [vmem:[#allocation103_spill] sm:$0xff]  ;;  %v2992_v52 = vld [vmem:[#allocation104_spill] sm:$0xff] }
  0xd7   : > { %696 = vmatpush.msrb.mxu2 %v2978_v47  ;;  %680 = vmatpush.msrb.mxu1 %v2985_v61  ;;  %v2989_v47 = vld [vmem:[#allocation99_spill] sm:$0xff] }
  0xd8   : > { %720 = vmatpush.msrb.mxu3 %v2987_v44  ;;  %661 = vmatpush.msrb.mxu0 %v2988_v45  ;;  %v2993_v61 = vld [vmem:[#allocation107_spill] sm:$0xff]  ;;  %v2994_v45 = vld [vmem:[#allocation108_spill] sm:$0xff] }
  0xd9   : > { %697 = vmatpush.msrb.mxu2 %v2982_v51  ;;  %681 = vmatpush.msrb.mxu1 %v2989_v47 }
  0xda   : > { %721 = vmatpush.msrb.mxu3 %v2990_v48  ;;  %662 = vmatpush.msrb.mxu0 %v2284_v62 }
  0xdb   : > { %698 = vmatpush.msrb.mxu2 %v2986_v43  ;;  %682 = vmatpush.msrb.mxu1 %v2991_v49  ;;  %v326_v49 = vld [vmem:[#allocation6] sm:$0xf] }
  0xdc   : > { %722 = vmatpush.msrb.mxu3 %v2992_v52  ;;  %663 = vmatpush.msrb.mxu0 %v2296_v57  ;;  %v2462_v62 = vperm.slane %v326_v49, 0  ;;  %v2464_v48 = vperm.slane %v326_v49, 1 }
  0xdd   : > { %699 = vmatpush.msrb.mxu2 %v2292_v63  ;;  %683 = vmatpush.msrb.mxu1 %v2993_v61 }
  0xde   : > { %723 = vmatpush.msrb.mxu3 %v2994_v45  ;;  %664 = vmatpush.msrb.mxu0 %v2308_v59  ;;  %2995 = vst [vmem:[#allocation117_spill] sm:$0xff] %v2462_v62 }
  0xdf   : > { %700 = vmatpush.msrb.mxu2 %v2304_v55  ;;  %684 = vmatpush.msrb.mxu1 %v2312_v60  ;;  %2996 = vst [vmem:[#allocation118_spill] sm:$0xff] %v2464_v48 }
  0xe0   : > { %724 = vmatpush.msrb.mxu3 %v2314_v53 }
  0xe1   : > { %701 = vmatpush.msrb.mxu2 %v2320_v0 }
  0xe3   : > { %702 = vmatpush.msrb.mxu2 %v2324_v56 }
  0xe5   : > { %703 = vmatpush.msrb.mxu2 %v2327_v58 }
  0xe7   : > { %704 = vmatpush.msrb.mxu2 %v2333_v54  ;;  %v2468_v54 = vperm.slane %v326_v49, 3 }
  0xe9   : > { %2997 = vst [vmem:[#allocation119_spill] sm:$0xff] %v2468_v54 }
 0x10b   : > { %v347_v52 = vpop.f32.mrf.mxu0  ;;  %v367_v57 = vpop.f32.mrf.mxu1 }
 0x112   : > { %v407_v61 = vpop.f32.mrf.mxu3 }
 0x114   : > { %v387_v44 = vpop.f32.mrf.mxu2 }
 0x11c   : > { %v427_v45 = vpop.f32.mrf.mxu0  ;;  %v447_v59 = vpop.f32.mrf.mxu1 }
 0x11d   : > { %v428_v0 = vadd.f32 %v427_v45, %v347_v52  ;;  %v448_v60 = vadd.f32 %v447_v59, %v367_v57 }
 0x11f   : > { %v499_v56 = vadd.f32 %v2462_v62, %v428_v0  ;;  %v500_v53 = vadd.f32 %v2464_v48, %v448_v60 }
 0x121   : > { %v1361_v47 = vmul.f32 -1.442695, %v499_v56  ;;  %v1362_v58 = vmul.f32 -1.442695, %v500_v53  ;;  %v2471_v53 = vperm.slane %v326_v49, 2 }
 0x123   : > { %1440 = vpow2.f32 %v1361_v47  ;;  %v487_v55 = vpop.f32.mrf.mxu3  ;;  %2998 = vst [vmem:[#allocation120_spill] sm:$0xff] %v2471_v53 }
 0x124   : > { %1442 = vpow2.f32 %v1362_v58  ;;  %v488_v50 = vadd.f32 %v487_v55, %v407_v61 }
 0x126   : > { %v502_v63 = vadd.f32 %v2468_v54, %v488_v50 }
 0x128   : > { %v1363_v41 = vmul.f32 -1.442695, %v502_v63 }
 0x129   : > { %v1441_v43 = vpop.eup %1440 }
 0x12a   : > { %v1443_v51 = vpop.eup %1442  ;;  %v506_v45 = vadd.f32 1.0, %v1441_v43  ;;  %1444 = vpow2.f32 %v1363_v41 }
 0x12b   : > { %v525_v52 = vadd.f32 1.0, %v1443_v51  ;;  %v467_v57 = vpop.f32.mrf.mxu2 }
 0x12c   : > { %1446 = vrcp.f32 %v506_v45  ;;  %v468_v56 = vadd.f32 %v467_v57, %v387_v44  ;;  %v518_v43 = vand.u32 2147483648, %v506_v45  ;;  %v516_v54 = vand.u32 2147483647, %v506_v45 }
 0x12d   : > { %1448 = vrcp.f32 %v525_v52  ;;  %v537_v41 = vand.u32 2147483648, %v525_v52  ;;  %v535_v49 = vand.u32 2147483647, %v525_v52  ;;  %vm512_vm2 = vweird.f32 %v506_v45 }
 0x12e   : > { %v501_v58 = vadd.f32 %v2471_v53, %v468_v56  ;;  %vm531_vm3 = vweird.f32 %v525_v52  ;;  %v519_v53 = vor.u32 1.1754944e-38, %v518_v43  ;;  %vm517_vm6 = vcmp.eq.f32.partialorder %v516_v54, 8.507059e+37 }
 0x12f   : > { %vm536_vm7 = vcmp.eq.f32.partialorder %v535_v49, 8.507059e+37  ;;  %v3043_v49 = vld [vmem:[#allocation81_spill] sm:$0xff] }
 0x130   : > { %v1445_v59 = vpop.eup %1444 }
 0x131   : > { %v545_v60 = vadd.f32 1.0, %v1445_v59 }
 0x132   : > { %v1447_v47 = vpop.eup %1446 }
 0x133   : > { %v1449_v55 = vpop.eup %1448  ;;  %v508_v0 = vmul.f32 %v1447_v47, %v506_v45  ;;  %1450 = vrcp.f32 %v545_v60  ;;  %vm513_vm0 = vweird.f32 %v1447_v47  ;;  %v557_v43 = vand.u32 2147483648, %v545_v60 }
 0x134   : > { %v527_v50 = vmul.f32 %v1449_v55, %v525_v52  ;;  %1452 = vtanh.f32 %v501_v58  ;;  %vm532_vm1 = vweird.f32 %v1449_v55  ;;  %vm514_vm4 = vmor %vm512_vm2, %vm513_vm0  ;;  %vm551_vm9 = vweird.f32 %v545_v60 }
 0x135   : > { %v509_v63 = vsub.f32 1.0, %v508_v0  ;;  %vm533_vm5 = vmor %vm531_vm3, %vm532_vm1  ;;  %v538_v0 = vor.u32 1.1754944e-38, %v537_v41  ;;  %v558_v41 = vor.u32 1.1754944e-38, %v557_v43  ;;  %v3054_v43 = vld [vmem:[#allocation79_spill] sm:$0xff] }
 0x136   : > { %v528_v61 = vsub.f32 1.0, %v527_v50  ;;  %v328_v50 = vld [vmem:[#allocation3] sm:$0xff] }
 0x137   : > { %v510_v51 = vmul.f32 %v1447_v47, %v509_v63 }
 0x138   : > { %v529_v44 = vmul.f32 %v1449_v55, %v528_v61 }
 0x139   : > { %v1451_v57 = vpop.eup %1450  ;;  %v511_v59 = vadd.f32 %v1447_v47, %v510_v51 }
 0x13a   : > { %v547_v56 = vmul.f32 %v1451_v57, %v545_v60  ;;  %v530_v48 = vadd.f32 %v1449_v55, %v529_v44  ;;  %v1453_v58 = vpop.eup %1452  ;;  %vm552_vm8 = vweird.f32 %v1451_v57  ;;  %v3042_v44 = vld [vmem:[#allocation67_spill] sm:$0xff] }
 0x13b   : > { %v515_v62 = vsel %vm514_vm4, %v1447_v47, %v511_v59  ;;  %v555_v47 = vand.u32 2147483647, %v545_v60  ;;  %vm553_vm10 = vmor %vm551_vm9, %vm552_vm8  ;;  %v3040_v60 = vld [vmem:[#allocation64_spill] sm:$0xff]  ;;  %v3045_v59 = vld [vmem:[#allocation70_spill] sm:$0xff] }
 0x13c   : > { %v548_v63 = vsub.f32 1.0, %v547_v56  ;;  %v520_v40 = vsel %vm517_vm6, %v519_v53, %v515_v62  ;;  %v534_v39 = vsel %vm533_vm5, %v1449_v55, %v530_v48  ;;  %v3038_v62 = vld [vmem:[#allocation63_spill] sm:$0xff]  ;;  %v3039_v53 = vld [vmem:[#allocation77_spill] sm:$0xff]  ;;  %v3041_v55 = vld [vmem:[#allocation66_spill] sm:$0xff] }
 0x13d   : > { %v539_v61 = vsel %vm536_vm7, %v538_v0, %v534_v39  ;;  %v562_v37 = vmul.f32 %v1453_v58, %v520_v40  ;;  %vm556_vm11 = vcmp.eq.f32.partialorder %v555_v47, 8.507059e+37  ;;  %v3046_v56 = vld [vmem:[#allocation71_spill] sm:$0xff]  ;;  %v3047_v0 = vld [vmem:[#allocation85_spill] sm:$0xff]  ;;  %v3049_v58 = vld [vmem:[#allocation74_spill] sm:$0xff] }
 0x13e   : > { %v549_v46 = vmul.f32 %v1451_v57, %v548_v63  ;;  %v561_v51 = vmul.f32 %v539_v61, %v328_v50  ;;  %v3048_v50 = vld [vmem:[#allocation72_spill] sm:$0xff]  ;;  %v3050_v63 = vld [vmem:[#allocation75_spill] sm:$0xff]  ;;  %v3051_v61 = vld [vmem:[#allocation89_spill] sm:$0xff] }
 0x13f   : > { %v3055_v47 = vld [vmem:[#allocation93_spill] sm:$0xff] }
 0x140   : > { %v2474_v45 = vadd.f32 %v562_v37, %v561_v51  ;;  %v550_v52 = vadd.f32 %v1451_v57, %v549_v46  ;;  %v1364_v37 = vld [vmem:[%s1931_s14 + $0x8] sm:$0xff]  ;;  %v3037_v46 = vld [vmem:[#allocation62_spill] sm:$0xff] }
 0x141   : > { %v3052_v51 = vld [vmem:[#allocation76_spill] sm:$0xff] }
 0x142   : > { %1454 = vtanh.f32 %v2474_v45  ;;  %v554_v54 = vsel %vm553_vm10, %v1451_v57, %v550_v52  ;;  %v3044_v57 = vld [vmem:[#allocation68_spill] sm:$0xff]  ;;  %v3053_v52 = vld [vmem:[#allocation78_spill] sm:$0xff] }
 0x143   : > { %v559_v39 = vsel %vm556_vm11, %v558_v41, %v554_v54  ;;  %v3056_v54 = vld [vmem:[#allocation80_spill] sm:$0xff]  ;;  %v3057_v41 = vld [vmem:[#allocation82_spill] sm:$0xff] }
 0x148   : > { %v1455_v48 = vpop.eup %1454 }
 0x149   : > { %v565_v40 = vmul.f32 %v1455_v48, %v559_v39  ;;  %v3058_v48 = vld [vmem:[#allocation83_spill] sm:$0xff]  ;;  %v3059_v39 = vld [vmem:[#allocation97_spill] sm:$0xff] }
 0x14b   : > { %585 = vmatmul.f32.vlgmr.msra.gmra.mxu0 %v565_v40  ;;  %566 = vst [vmem:[%s1937_s9] sm:$0xff] %v565_v40  ;;  %605 = vmatmul.f32.vlgmr.msra.gmra.mxu1 %v565_v40 }
 0x14c   : > { %625 = vmatmul.f32.vlgmr.msra.gmra.mxu2 %v565_v40  ;;  %645 = vmatmul.f32.vlgmr.msra.gmra.mxu3 %v565_v40  ;;  %v3060_v40 = vld [vmem:[#allocation84_spill] sm:$0xff] }
 0x14d   : > { %800 = vmatpush.msra.mxu0 %v1949_v1  ;;  %820 = vmatpush.msra.mxu1 %v1951_v2  ;;  %v2999_v1 = vld [vmem:[#allocation34_spill] sm:$0xff]  ;;  %v3000_v2 = vld [vmem:[#allocation27_spill] sm:$0xff] }
 0x14e   : > { %840 = vmatpush.msra.mxu2 %v1977_v12  ;;  %860 = vmatpush.msra.mxu3 %v1953_v3  ;;  %v3001_v3 = vld [vmem:[#allocation28_spill] sm:$0xff] }
 0x14f   : > { %801 = vmatpush.msra.mxu0 %v1957_v4  ;;  %821 = vmatpush.msra.mxu1 %v1959_v5  ;;  %v3002_v4 = vld [vmem:[#allocation29_spill] sm:$0xff]  ;;  %v3003_v5 = vld [vmem:[#allocation38_spill] sm:$0xff]  ;;  %v3010_v12 = vld [vmem:[#allocation36_spill] sm:$0xff] }
 0x150   : > { %841 = vmatpush.msra.mxu2 %v1983_v14  ;;  %861 = vmatpush.msra.mxu3 %v1961_v6  ;;  %v3004_v6 = vld [vmem:[#allocation30_spill] sm:$0xff]  ;;  %v3012_v14 = vld [vmem:[#allocation37_spill] sm:$0xff] }
 0x151   : > { %802 = vmatpush.msra.mxu0 %v1964_v7  ;;  %822 = vmatpush.msra.mxu1 %v1966_v8  ;;  %v3005_v7 = vld [vmem:[#allocation31_spill] sm:$0xff]  ;;  %v3006_v8 = vld [vmem:[#allocation32_spill] sm:$0xff] }
 0x152   : > { %842 = vmatpush.msra.mxu2 %v1995_v18  ;;  %862 = vmatpush.msra.mxu3 %v1970_v9  ;;  %v3007_v9 = vld [vmem:[#allocation42_spill] sm:$0xff]  ;;  %v3016_v18 = vld [vmem:[#allocation41_spill] sm:$0xff] }
 0x153   : > { %665 = vmatmul.f32.vlgmr.msrb.gmra.mxu0 %v1364_v37  ;;  %685 = vmatmul.f32.vlgmr.msrb.gmra.mxu1 %v1364_v37 }
 0x154   : > { %705 = vmatmul.f32.vlgmr.msrb.gmra.mxu2 %v1364_v37  ;;  %725 = vmatmul.f32.vlgmr.msrb.gmra.mxu3 %v1364_v37  ;;  %v3061_v37 = vld [vmem:[#allocation86_spill] sm:$0xff] }
 0x155   : > { %803 = vmatpush.msra.mxu0 %v1973_v10  ;;  %823 = vmatpush.msra.mxu1 %v1975_v11  ;;  %v3008_v10 = vld [vmem:[#allocation33_spill] sm:$0xff]  ;;  %v3009_v11 = vld [vmem:[#allocation35_spill] sm:$0xff] }
 0x156   : > { %843 = vmatpush.msra.mxu2 %v2007_v22  ;;  %863 = vmatpush.msra.mxu3 %v1981_v13  ;;  %v3011_v13 = vld [vmem:[#allocation46_spill] sm:$0xff]  ;;  %v3020_v22 = vld [vmem:[#allocation45_spill] sm:$0xff] }
 0x157   : > { %804 = vmatpush.msra.mxu0 %v1987_v15  ;;  %824 = vmatpush.msra.mxu1 %v1989_v16  ;;  %v3013_v15 = vld [vmem:[#allocation39_spill] sm:$0xff]  ;;  %v3014_v16 = vld [vmem:[#allocation40_spill] sm:$0xff] }
 0x158   : > { %844 = vmatpush.msra.mxu2 %v2019_v26  ;;  %864 = vmatpush.msra.mxu3 %v1993_v17  ;;  %v3015_v17 = vld [vmem:[#allocation53_spill] sm:$0xff] }
 0x159   : > { %805 = vmatpush.msra.mxu0 %v1999_v19  ;;  %825 = vmatpush.msra.mxu1 %v2001_v20  ;;  %v3017_v19 = vld [vmem:[#allocation43_spill] sm:$0xff]  ;;  %v3018_v20 = vld [vmem:[#allocation44_spill] sm:$0xff]  ;;  %v3024_v26 = vld [vmem:[#allocation49_spill] sm:$0xff] }
 0x15a   : > { %845 = vmatpush.msra.mxu2 %v2031_v30  ;;  %865 = vmatpush.msra.mxu3 %v2005_v21  ;;  %v3019_v21 = vld [vmem:[#allocation57_spill] sm:$0xff]  ;;  %v3028_v30 = vld [vmem:[#allocation52_spill] sm:$0xff] }
 0x15b   : > { %806 = vmatpush.msra.mxu0 %v2011_v23  ;;  %826 = vmatpush.msra.mxu1 %v2013_v24  ;;  %v3021_v23 = vld [vmem:[#allocation47_spill] sm:$0xff]  ;;  %v3022_v24 = vld [vmem:[#allocation48_spill] sm:$0xff] }
 0x15c   : > { %846 = vmatpush.msra.mxu2 %v2043_v34  ;;  %866 = vmatpush.msra.mxu3 %v2017_v25  ;;  %v3023_v25 = vld [vmem:[#allocation61_spill] sm:$0xff]  ;;  %v3032_v34 = vld [vmem:[#allocation56_spill] sm:$0xff] }
 0x15d   : > { %807 = vmatpush.msra.mxu0 %v2023_v27  ;;  %827 = vmatpush.msra.mxu1 %v2025_v28  ;;  %v3025_v27 = vld [vmem:[#allocation50_spill] sm:$0xff]  ;;  %v3026_v28 = vld [vmem:[#allocation51_spill] sm:$0xff] }
 0x15e   : > { %847 = vmatpush.msra.mxu2 %v2055_v38  ;;  %867 = vmatpush.msra.mxu3 %v2029_v29  ;;  %v3027_v29 = vld [vmem:[#allocation65_spill] sm:$0xff] }
 0x15f   : > { %808 = vmatpush.msra.mxu0 %v2035_v31  ;;  %828 = vmatpush.msra.mxu1 %v2037_v32  ;;  %v3029_v31 = vld [vmem:[#allocation54_spill] sm:$0xff]  ;;  %v3030_v32 = vld [vmem:[#allocation55_spill] sm:$0xff]  ;;  %v3035_v38 = vld [vmem:[#allocation73_spill] sm:$0xff] }
 0x160   : > { %848 = vmatpush.msra.mxu2 %v2067_v42  ;;  %868 = vmatpush.msra.mxu3 %v2041_v33  ;;  %v3031_v33 = vld [vmem:[#allocation69_spill] sm:$0xff]  ;;  %v3036_v42 = vld [vmem:[#allocation60_spill] sm:$0xff] }
 0x161   : > { %809 = vmatpush.msra.mxu0 %v2047_v35  ;;  %829 = vmatpush.msra.mxu1 %v2049_v36  ;;  %v3033_v35 = vld [vmem:[#allocation58_spill] sm:$0xff]  ;;  %v3034_v36 = vld [vmem:[#allocation59_spill] sm:$0xff] }
 0x162   : > { %849 = vmatpush.msra.mxu2 %v2999_v1  ;;  %869 = vmatpush.msra.mxu3 %v3000_v2  ;;  %v3062_v1 = vld [vmem:[#allocation87_spill] sm:$0xff]  ;;  %v3063_v2 = vld [vmem:[#allocation101_spill] sm:$0xff] }
 0x163   : > { %810 = vmatpush.msra.mxu0 %v3001_v3  ;;  %830 = vmatpush.msra.mxu1 %v3002_v4  ;;  %v3064_v3 = vld [vmem:[#allocation88_spill] sm:$0xff]  ;;  %v3065_v4 = vld [vmem:[#allocation90_spill] sm:$0xff] }
 0x164   : > { %850 = vmatpush.msra.mxu2 %v3003_v5  ;;  %870 = vmatpush.msra.mxu3 %v3004_v6  ;;  %v3066_v5 = vld [vmem:[#allocation91_spill] sm:$0xff]  ;;  %v3067_v6 = vld [vmem:[#allocation105_spill] sm:$0xff] }
 0x165   : > { %811 = vmatpush.msra.mxu0 %v3005_v7  ;;  %831 = vmatpush.msra.mxu1 %v3006_v8  ;;  %v3068_v7 = vld [vmem:[#allocation92_spill] sm:$0xff]  ;;  %v3069_v8 = vld [vmem:[#allocation94_spill] sm:$0xff] }
 0x166   : > { %851 = vmatpush.msra.mxu2 %v3007_v9  ;;  %871 = vmatpush.msra.mxu3 %v3008_v10  ;;  %v3070_v9 = vld [vmem:[#allocation95_spill] sm:$0xff]  ;;  %v3071_v10 = vld [vmem:[#allocation109_spill] sm:$0xff] }
 0x167   : > { %812 = vmatpush.msra.mxu0 %v3009_v11  ;;  %832 = vmatpush.msra.mxu1 %v3010_v12  ;;  %v3072_v11 = vld [vmem:[#allocation96_spill] sm:$0xff]  ;;  %v3073_v12 = vld [vmem:[#allocation98_spill] sm:$0xff] }
 0x168   : > { %852 = vmatpush.msra.mxu2 %v3011_v13  ;;  %872 = vmatpush.msra.mxu3 %v3012_v14  ;;  %v3074_v13 = vld [vmem:[#allocation99_spill] sm:$0xff]  ;;  %v3075_v14 = vld [vmem:[#allocation113_spill] sm:$0xff] }
 0x169   : > { %813 = vmatpush.msra.mxu0 %v3013_v15  ;;  %833 = vmatpush.msra.mxu1 %v3014_v16  ;;  %v3076_v15 = vld [vmem:[#allocation100_spill] sm:$0xff]  ;;  %v3077_v16 = vld [vmem:[#allocation102_spill] sm:$0xff] }
 0x16a   : > { %853 = vmatpush.msra.mxu2 %v3015_v17  ;;  %873 = vmatpush.msra.mxu3 %v3016_v18  ;;  %v3078_v17 = vld [vmem:[#allocation103_spill] sm:$0xff]  ;;  %v3079_v18 = vld [vmem:[#allocation114_spill] sm:$0xff] }
 0x16b   : > { %814 = vmatpush.msra.mxu0 %v3017_v19  ;;  %834 = vmatpush.msra.mxu1 %v3018_v20  ;;  %v3080_v19 = vld [vmem:[#allocation104_spill] sm:$0xff]  ;;  %v3081_v20 = vld [vmem:[#allocation106_spill] sm:$0xff] }
 0x16c   : > { %854 = vmatpush.msra.mxu2 %v3019_v21  ;;  %874 = vmatpush.msra.mxu3 %v3020_v22  ;;  %v3082_v21 = vld [vmem:[#allocation107_spill] sm:$0xff] }
 0x16d   : > { %815 = vmatpush.msra.mxu0 %v3021_v23  ;;  %835 = vmatpush.msra.mxu1 %v3022_v24  ;;  %v3083_v22 = vld [vmem:[#allocation115_spill] sm:$0xff]  ;;  %v3084_v23 = vld [vmem:[#allocation108_spill] sm:$0xff]  ;;  %v3085_v24 = vld [vmem:[#allocation110_spill] sm:$0xff] }
 0x16e   : > { %855 = vmatpush.msra.mxu2 %v3023_v25  ;;  %875 = vmatpush.msra.mxu3 %v3024_v26  ;;  %v3086_v25 = vld [vmem:[#allocation111_spill] sm:$0xff]  ;;  %v3087_v26 = vld [vmem:[#allocation116_spill] sm:$0xff] }
 0x16f   : > { %880 = vmatpush.msrb.mxu0 %v3025_v27  ;;  %900 = vmatpush.msrb.mxu1 %v3026_v28  ;;  %v3088_v27 = vld [vmem:[#allocation112_spill] sm:$0xff] }
 0x170   : > { %920 = vmatpush.msrb.mxu2 %v3027_v29  ;;  %940 = vmatpush.msrb.mxu3 %v3028_v30 }
 0x171   : > { %881 = vmatpush.msrb.mxu0 %v3029_v31  ;;  %901 = vmatpush.msrb.mxu1 %v3030_v32 }
 0x172   : > { %921 = vmatpush.msrb.mxu2 %v3031_v33  ;;  %941 = vmatpush.msrb.mxu3 %v3032_v34 }
 0x173   : > { %882 = vmatpush.msrb.mxu0 %v3033_v35  ;;  %902 = vmatpush.msrb.mxu1 %v3034_v36  ;;  %v3089_v35 = vld [vmem:[#allocation117_spill] sm:$0xff] }
 0x174   : > { %922 = vmatpush.msrb.mxu2 %v3035_v38  ;;  %942 = vmatpush.msrb.mxu3 %v3036_v42  ;;  %v3090_v38 = vld [vmem:[#allocation118_spill] sm:$0xff] }
 0x175   : > { %883 = vmatpush.msrb.mxu0 %v3037_v46  ;;  %903 = vmatpush.msrb.mxu1 %v3038_v62 }
 0x176   : > { %923 = vmatpush.msrb.mxu2 %v3039_v53  ;;  %943 = vmatpush.msrb.mxu3 %v3040_v60 }
 0x177   : > { %884 = vmatpush.msrb.mxu0 %v3041_v55  ;;  %904 = vmatpush.msrb.mxu1 %v3042_v44  ;;  %v3091_v44 = vld [vmem:[#allocation119_spill] sm:$0xff] }
 0x178   : > { %924 = vmatpush.msrb.mxu2 %v3043_v49  ;;  %944 = vmatpush.msrb.mxu3 %v3044_v57 }
 0x179   : > { %885 = vmatpush.msrb.mxu0 %v3045_v59  ;;  %905 = vmatpush.msrb.mxu1 %v3046_v56 }
 0x17a   : > { %925 = vmatpush.msrb.mxu2 %v3047_v0  ;;  %945 = vmatpush.msrb.mxu3 %v3048_v50 }
 0x17b   : > { %886 = vmatpush.msrb.mxu0 %v3049_v58  ;;  %906 = vmatpush.msrb.mxu1 %v3050_v63 }
 0x17c   : > { %926 = vmatpush.msrb.mxu2 %v3051_v61  ;;  %946 = vmatpush.msrb.mxu3 %v3052_v51 }
 0x17d   : > { %887 = vmatpush.msrb.mxu0 %v3053_v52  ;;  %907 = vmatpush.msrb.mxu1 %v3054_v43  ;;  %v3092_v43 = vld [vmem:[#allocation120_spill] sm:$0xff] }
 0x17e   : > { %927 = vmatpush.msrb.mxu2 %v3055_v47  ;;  %947 = vmatpush.msrb.mxu3 %v3056_v54 }
 0x17f   : > { %888 = vmatpush.msrb.mxu0 %v3057_v41  ;;  %908 = vmatpush.msrb.mxu1 %v3058_v48 }
 0x180   : > { %928 = vmatpush.msrb.mxu2 %v3059_v39  ;;  %948 = vmatpush.msrb.mxu3 %v3060_v40 }
 0x181   : > { %889 = vmatpush.msrb.mxu0 %v3061_v37  ;;  %909 = vmatpush.msrb.mxu1 %v3062_v1 }
 0x182   : > { %929 = vmatpush.msrb.mxu2 %v3063_v2  ;;  %949 = vmatpush.msrb.mxu3 %v3064_v3 }
 0x183   : > { %890 = vmatpush.msrb.mxu0 %v3065_v4  ;;  %910 = vmatpush.msrb.mxu1 %v3066_v5 }
 0x184   : > { %930 = vmatpush.msrb.mxu2 %v3067_v6  ;;  %950 = vmatpush.msrb.mxu3 %v3068_v7 }
 0x185   : > { %891 = vmatpush.msrb.mxu0 %v3069_v8  ;;  %911 = vmatpush.msrb.mxu1 %v3070_v9 }
 0x186   : > { %931 = vmatpush.msrb.mxu2 %v3071_v10  ;;  %951 = vmatpush.msrb.mxu3 %v3072_v11 }
 0x187   : > { %892 = vmatpush.msrb.mxu0 %v3073_v12  ;;  %912 = vmatpush.msrb.mxu1 %v3074_v13 }
 0x188   : > { %932 = vmatpush.msrb.mxu2 %v3075_v14  ;;  %952 = vmatpush.msrb.mxu3 %v3076_v15 }
 0x189   : > { %893 = vmatpush.msrb.mxu0 %v3077_v16  ;;  %913 = vmatpush.msrb.mxu1 %v3078_v17 }
 0x18a   : > { %933 = vmatpush.msrb.mxu2 %v3079_v18  ;;  %953 = vmatpush.msrb.mxu3 %v3080_v19 }
 0x18b   : > { %894 = vmatpush.msrb.mxu0 %v3081_v20  ;;  %914 = vmatpush.msrb.mxu1 %v3082_v21 }
 0x18c   : > { %934 = vmatpush.msrb.mxu2 %v3083_v22  ;;  %954 = vmatpush.msrb.mxu3 %v3084_v23 }
 0x18d   : > { %895 = vmatpush.msrb.mxu0 %v3085_v24  ;;  %915 = vmatpush.msrb.mxu1 %v3086_v25 }
 0x18e   : > { %935 = vmatpush.msrb.mxu2 %v3087_v26  ;;  %955 = vmatpush.msrb.mxu3 %v3088_v27 }
 0x1c8   : > { %v586_v28 = vpop.f32.mrf.mxu0  ;;  %v606_v29 = vpop.f32.mrf.mxu1 }
 0x1cf   : > { %v646_v30 = vpop.f32.mrf.mxu3  ;;  %v626_v46 = vpop.f32.mrf.mxu2 }
 0x1d0   : > { %v666_v31 = vpop.f32.mrf.mxu0  ;;  %v686_v32 = vpop.f32.mrf.mxu1 }
 0x1d1   : > { %v667_v33 = vadd.f32 %v666_v31, %v586_v28  ;;  %v687_v34 = vadd.f32 %v686_v32, %v606_v29  ;;  %v1506_v31 = vld [vmem:[#allocation5 + $0x1f0] sm:$0xff]  ;;  %v1507_v32 = vld [vmem:[#allocation5 + $0x1f8] sm:$0xff] }
 0x1d3   : > { %v729_v36 = vadd.f32 %v667_v33, %v3089_v35  ;;  %v730_v42 = vadd.f32 %v687_v34, %v3090_v38  ;;  %v1508_v33 = vld [vmem:[#allocation5 + $0x1c0] sm:$0xff]  ;;  %v1509_v34 = vld [vmem:[#allocation5 + $0x1c8] sm:$0xff] }
 0x1d5   : > { %v1365_v62 = vmul.f32 -1.442695, %v729_v36  ;;  %v1366_v53 = vmul.f32 -1.442695, %v730_v42  ;;  %v1369_v36 = vld [vmem:[%s1931_s14 + $0x10] sm:$0xff] }
 0x1d6   : > { %v1510_v42 = vld [vmem:[#allocation5 + $0x1d0] sm:$0xff] }
 0x1d7   : > { %1456 = vpow2.f32 %v1365_v62  ;;  %v726_v60 = vpop.f32.mrf.mxu3  ;;  %v706_v58 = vpop.f32.mrf.mxu2  ;;  %v1512_v62 = vld [vmem:[#allocation5 + $0x1a0] sm:$0xff] }
 0x1d8   : > { %1458 = vpow2.f32 %v1366_v53  ;;  %v727_v55 = vadd.f32 %v726_v60, %v646_v30  ;;  %v707_v63 = vadd.f32 %v706_v58, %v626_v46  ;;  %v1505_v30 = vld [vmem:[#allocation5 + $0x1e8] sm:$0xff]  ;;  %v1511_v46 = vld [vmem:[#allocation5 + $0x1d8] sm:$0xff]  ;;  %v1514_v60 = vld [vmem:[#allocation5 + $0x1b0] sm:$0xff] }
 0x1d9   : > { %v1513_v53 = vld [vmem:[#allocation5 + $0x1a8] sm:$0xff]  ;;  %v1522_v58 = vld [vmem:[#allocation5 + $0x170] sm:$0xff] }
 0x1da   : > { %v732_v49 = vadd.f32 %v727_v55, %v3091_v44  ;;  %v731_v47 = vadd.f32 %v707_v63, %v3092_v43  ;;  %v1515_v55 = vld [vmem:[#allocation5 + $0x1b8] sm:$0xff] }
 0x1db   : > { %v1523_v63 = vld [vmem:[#allocation5 + $0x178] sm:$0xff] }
 0x1dc   : > { %v1367_v57 = vmul.f32 -1.442695, %v732_v49  ;;  %v1516_v49 = vld [vmem:[#allocation5 + $0x180] sm:$0xff] }
 0x1dd   : > { %v1457_v59 = vpop.eup %1456 }
 0x1de   : > { %v1459_v56 = vpop.eup %1458  ;;  %v736_v0 = vadd.f32 1.0, %v1457_v59  ;;  %1460 = vpow2.f32 %v1367_v57  ;;  %v1517_v57 = vld [vmem:[#allocation5 + $0x188] sm:$0xff]  ;;  %v1518_v59 = vld [vmem:[#allocation5 + $0x190] sm:$0xff] }
 0x1df   : > { %v755_v50 = vadd.f32 1.0, %v1459_v56  ;;  %v1519_v56 = vld [vmem:[#allocation5 + $0x198] sm:$0xff] }
 0x1e0   : > { %1462 = vrcp.f32 %v736_v0  ;;  %v748_v37 = vand.u32 2147483648, %v736_v0  ;;  %v746_v3 = vand.u32 2147483647, %v736_v0  ;;  %vm742_vm14 = vweird.f32 %v736_v0 }
 0x1e1   : > { %1464 = vrcp.f32 %v755_v50  ;;  %v767_v1 = vand.u32 2147483648, %v755_v50  ;;  %v765_v5 = vand.u32 2147483647, %v755_v50  ;;  %vm761_vm15 = vweird.f32 %v755_v50 }
 0x1e2   : > { %v749_v8 = vor.u32 1.1754944e-38, %v748_v37  ;;  %vm747_vm2 = vcmp.eq.f32.partialorder %v746_v3, 8.507059e+37  ;;  %v1533_v37 = vld [vmem:[#allocation5 + $0x108] sm:$0xff]  ;;  %v1536_v3 = vld [vmem:[#allocation5 + $0xe0] sm:$0xff] }
 0x1e3   : > { %v768_v11 = vor.u32 1.1754944e-38, %v767_v1  ;;  %vm766_vm3 = vcmp.eq.f32.partialorder %v765_v5, 8.507059e+37  ;;  %v1534_v1 = vld [vmem:[#allocation5 + $0x110] sm:$0xff] }
 0x1e4   : > { %v1461_v61 = vpop.eup %1460  ;;  %v1538_v5 = vld [vmem:[#allocation5 + $0xf0] sm:$0xff] }
 0x1e5   : > { %v775_v51 = vadd.f32 1.0, %v1461_v61  ;;  %v1524_v61 = vld [vmem:[#allocation5 + $0x140] sm:$0xff] }
 0x1e6   : > { %v1463_v52 = vpop.eup %1462 }
 0x1e7   : > { %v1465_v54 = vpop.eup %1464  ;;  %v738_v41 = vmul.f32 %v1463_v52, %v736_v0  ;;  %1466 = vrcp.f32 %v775_v51  ;;  %vm743_vm12 = vweird.f32 %v1463_v52  ;;  %v787_v23 = vand.u32 2147483648, %v775_v51  ;;  %v1520_v0 = vld [vmem:[#allocation5 + $0x160] sm:$0xff] }
 0x1e8   : > { %v757_v48 = vmul.f32 %v1465_v54, %v755_v50  ;;  %1468 = vtanh.f32 %v731_v47  ;;  %vm762_vm13 = vweird.f32 %v1465_v54  ;;  %vm744_vm0 = vmor %vm742_vm14, %vm743_vm12  ;;  %vm781_vm5 = vweird.f32 %v775_v51  ;;  %v1521_v50 = vld [vmem:[#allocation5 + $0x168] sm:$0xff]  ;;  %v1527_v47 = vld [vmem:[#allocation5 + $0x158] sm:$0xff] }
 0x1e9   : > { %v739_v39 = vsub.f32 1.0, %v738_v41  ;;  %vm763_vm1 = vmor %vm761_vm15, %vm762_vm13  ;;  %v785_v24 = vand.u32 2147483647, %v775_v51  ;;  %v788_v26 = vor.u32 1.1754944e-38, %v787_v23  ;;  %v1529_v41 = vld [vmem:[#allocation5 + $0x128] sm:$0xff]  ;;  %v1555_v23 = vld [vmem:[#allocation5 + $0x78] sm:$0xff] }
 0x1ea   : > { %v758_v40 = vsub.f32 1.0, %v757_v48  ;;  %v1530_v48 = vld [vmem:[#allocation5 + $0x130] sm:$0xff] }
 0x1eb   : > { %v740_v2 = vmul.f32 %v1463_v52, %v739_v39  ;;  %vm786_vm7 = vcmp.eq.f32.partialorder %v785_v24, 8.507059e+37  ;;  %v1531_v39 = vld [vmem:[#allocation5 + $0x138] sm:$0xff]  ;;  %v1556_v24 = vld [vmem:[#allocation5 + $0x40] sm:$0xff] }
 0x1ec   : > { %v759_v4 = vmul.f32 %v1465_v54, %v758_v40  ;;  %v1532_v40 = vld [vmem:[#allocation5 + $0x100] sm:$0xff] }
 0x1ed   : > { %v1467_v6 = vpop.eup %1466  ;;  %v741_v7 = vadd.f32 %v1463_v52, %v740_v2  ;;  %v1535_v2 = vld [vmem:[#allocation5 + $0x118] sm:$0xff] }
 0x1ee   : > { %v760_v9 = vadd.f32 %v1465_v54, %v759_v4  ;;  %v777_v10 = vmul.f32 %v1467_v6, %v775_v51  ;;  %v1469_v13 = vpop.eup %1468  ;;  %vm782_vm4 = vweird.f32 %v1467_v6  ;;  %v1525_v51 = vld [vmem:[#allocation5 + $0x148] sm:$0xff] }
 0x1ef   : > { %v745_v12 = vsel %vm744_vm0, %v1463_v52, %v741_v7  ;;  %vm783_vm6 = vmor %vm781_vm5, %vm782_vm4  ;;  %v1526_v52 = vld [vmem:[#allocation5 + $0x150] sm:$0xff]  ;;  %v1537_v4 = vld [vmem:[#allocation5 + $0xe8] sm:$0xff] }
 0x1f0   : > { %v750_v14 = vsel %vm747_vm2, %v749_v8, %v745_v12  ;;  %v764_v15 = vsel %vm763_vm1, %v1465_v54, %v760_v9  ;;  %v778_v16 = vsub.f32 1.0, %v777_v10  ;;  %v1528_v54 = vld [vmem:[#allocation5 + $0x120] sm:$0xff]  ;;  %v1541_v8 = vld [vmem:[#allocation5 + $0xc8] sm:$0xff]  ;;  %v1542_v9 = vld [vmem:[#allocation5 + $0xd0] sm:$0xff] }
 0x1f1   : > { %v769_v17 = vsel %vm766_vm3, %v768_v11, %v764_v15  ;;  %v792_v18 = vmul.f32 %v1469_v13, %v750_v14  ;;  %v1540_v7 = vld [vmem:[#allocation5 + $0xc0] sm:$0xff]  ;;  %v1543_v10 = vld [vmem:[#allocation5 + $0xd8] sm:$0xff]  ;;  %v1545_v12 = vld [vmem:[#allocation5 + $0xa8] sm:$0xff] }
 0x1f2   : > { %v791_v19 = vmul.f32 %v769_v17, %v2474_v45  ;;  %v779_v20 = vmul.f32 %v1467_v6, %v778_v16  ;;  %v1504_v45 = vld [vmem:[#allocation5 + $0x1e0] sm:$0xff]  ;;  %v1546_v13 = vld [vmem:[#allocation5 + $0xb0] sm:$0xff]  ;;  %v1547_v14 = vld [vmem:[#allocation5 + $0xb8] sm:$0xff] }
 0x1f3   : > { %v1544_v11 = vld [vmem:[#allocation5 + $0xa0] sm:$0xff]  ;;  %v1549_v16 = vld [vmem:[#allocation5 + $0x88] sm:$0xff]  ;;  %v1550_v17 = vld [vmem:[#allocation5 + $0x90] sm:$0xff] }
 0x1f4   : > { %v2612_v21 = vadd.f32 %v792_v18, %v791_v19  ;;  %v780_v22 = vadd.f32 %v1467_v6, %v779_v20  ;;  %v1548_v15 = vld [vmem:[#allocation5 + $0x80] sm:$0xff]  ;;  %v1551_v18 = vld [vmem:[#allocation5 + $0x98] sm:$0xff]  ;;  %v1553_v20 = vld [vmem:[#allocation5 + $0x68] sm:$0xff] }
 0x1f5   : > { %v1552_v19 = vld [vmem:[#allocation5 + $0x60] sm:$0xff] }
 0x1f6   : > { %1470 = vtanh.f32 %v2612_v21  ;;  %v784_v25 = vsel %vm783_vm6, %v1467_v6, %v780_v22  ;;  %v1539_v6 = vld [vmem:[#allocation5 + $0xf8] sm:$0xff]  ;;  %v1554_v22 = vld [vmem:[#allocation5 + $0x70] sm:$0xff] }
 0x1f7   : > { %v789_v28 = vsel %vm786_vm7, %v788_v26, %v784_v25  ;;  %v1557_v25 = vld [vmem:[#allocation5 + $0x48] sm:$0xff]  ;;  %v1558_v26 = vld [vmem:[#allocation5 + $0x50] sm:$0xff] }
 0x1fc   : > { %v1471_v27 = vpop.eup %1470 }
 0x1fd   : > { %v795_v29 = vmul.f32 %v1471_v27, %v789_v28  ;;  %v1559_v27 = vld [vmem:[#allocation5 + $0x58] sm:$0xff]  ;;  %v1560_v28 = vld [vmem:[#allocation5 + $0x20] sm:$0xff] }
 0x1ff   : > { %816 = vmatmul.f32.vlgmr.msra.gmra.mxu0 %v795_v29  ;;  %1368 = vst [vmem:[%s1937_s9 + $0x8] sm:$0xff] %v795_v29  ;;  %836 = vmatmul.f32.vlgmr.msra.gmra.mxu1 %v795_v29 }
 0x200   : > { %856 = vmatmul.f32.vlgmr.msra.gmra.mxu2 %v795_v29  ;;  %876 = vmatmul.f32.vlgmr.msra.gmra.mxu3 %v795_v29  ;;  %v1561_v29 = vld [vmem:[#allocation5 + $0x28] sm:$0xff] }
 0x201   : > { %1031 = vmatpush.msra.mxu0 %v1504_v45  ;;  %1051 = vmatpush.msra.mxu1 %v1505_v30  ;;  %v1562_v45 = vld [vmem:[#allocation5 + $0x30] sm:$0xff]  ;;  %v1563_v30 = vld [vmem:[#allocation5 + $0x38] sm:$0xff] }
 0x202   : > { %1071 = vmatpush.msra.mxu2 %v1506_v31  ;;  %1091 = vmatpush.msra.mxu3 %v1507_v32  ;;  %v1564_v31 = vld [vmem:[#allocation5] sm:$0xff]  ;;  %v1565_v32 = vld [vmem:[#allocation5 + $0x8] sm:$0xff] }
 0x203   : > { %1032 = vmatpush.msra.mxu0 %v1508_v33  ;;  %1052 = vmatpush.msra.mxu1 %v1509_v34  ;;  %v1566_v33 = vld [vmem:[#allocation5 + $0x10] sm:$0xff]  ;;  %v1567_v34 = vld [vmem:[#allocation5 + $0x18] sm:$0xff] }
 0x204   : > { %1072 = vmatpush.msra.mxu2 %v1510_v42  ;;  %1092 = vmatpush.msra.mxu3 %v1511_v46  ;;  %v1569_v42 = vld [vmem:[#allocation4 + $0x1e8] sm:$0xff]  ;;  %v1570_v46 = vld [vmem:[#allocation4 + $0x1f0] sm:$0xff] }
 0x205   : > { %1033 = vmatpush.msra.mxu0 %v1512_v62  ;;  %1053 = vmatpush.msra.mxu1 %v1513_v53  ;;  %v1571_v62 = vld [vmem:[#allocation4 + $0x1f8] sm:$0xff]  ;;  %v1572_v53 = vld [vmem:[#allocation4 + $0x1c0] sm:$0xff] }
 0x206   : > { %1073 = vmatpush.msra.mxu2 %v1514_v60  ;;  %1093 = vmatpush.msra.mxu3 %v1515_v55  ;;  %v1573_v60 = vld [vmem:[#allocation4 + $0x1c8] sm:$0xff]  ;;  %v1574_v55 = vld [vmem:[#allocation4 + $0x1d0] sm:$0xff] }
 0x207   : > { %896 = vmatmul.f32.vlgmr.msrb.gmra.mxu0 %v1369_v36  ;;  %916 = vmatmul.f32.vlgmr.msrb.gmra.mxu1 %v1369_v36 }
 0x208   : > { %936 = vmatmul.f32.vlgmr.msrb.gmra.mxu2 %v1369_v36  ;;  %956 = vmatmul.f32.vlgmr.msrb.gmra.mxu3 %v1369_v36  ;;  %v1568_v36 = vld [vmem:[#allocation4 + $0x1e0] sm:$0xff] }
 0x209   : > { %1034 = vmatpush.msra.mxu0 %v1516_v49  ;;  %1054 = vmatpush.msra.mxu1 %v1517_v57  ;;  %v1575_v49 = vld [vmem:[#allocation4 + $0x1d8] sm:$0xff]  ;;  %v1576_v57 = vld [vmem:[#allocation4 + $0x1a0] sm:$0xff] }
 0x20a   : > { %1074 = vmatpush.msra.mxu2 %v1518_v59  ;;  %1094 = vmatpush.msra.mxu3 %v1519_v56  ;;  %v1577_v59 = vld [vmem:[#allocation4 + $0x1a8] sm:$0xff]  ;;  %v1578_v56 = vld [vmem:[#allocation4 + $0x1b0] sm:$0xff] }
 0x20b   : > { %1035 = vmatpush.msra.mxu0 %v1520_v0  ;;  %1055 = vmatpush.msra.mxu1 %v1521_v50  ;;  %v1579_v0 = vld [vmem:[#allocation4 + $0x1b8] sm:$0xff]  ;;  %v1580_v50 = vld [vmem:[#allocation4 + $0x180] sm:$0xff] }
 0x20c   : > { %1075 = vmatpush.msra.mxu2 %v1522_v58  ;;  %1095 = vmatpush.msra.mxu3 %v1523_v63  ;;  %v1581_v58 = vld [vmem:[#allocation4 + $0x188] sm:$0xff]  ;;  %v1582_v63 = vld [vmem:[#allocation4 + $0x190] sm:$0xff] }
 0x20d   : > { %1036 = vmatpush.msra.mxu0 %v1524_v61  ;;  %1056 = vmatpush.msra.mxu1 %v1525_v51  ;;  %v1583_v61 = vld [vmem:[#allocation4 + $0x198] sm:$0xff]  ;;  %v1584_v51 = vld [vmem:[#allocation4 + $0x160] sm:$0xff] }
 0x20e   : > { %1076 = vmatpush.msra.mxu2 %v1526_v52  ;;  %1096 = vmatpush.msra.mxu3 %v1527_v47  ;;  %v1585_v52 = vld [vmem:[#allocation4 + $0x168] sm:$0xff]  ;;  %v1586_v47 = vld [vmem:[#allocation4 + $0x170] sm:$0xff] }
 0x20f   : > { %1037 = vmatpush.msra.mxu0 %v1528_v54  ;;  %1057 = vmatpush.msra.mxu1 %v1529_v41  ;;  %v1587_v54 = vld [vmem:[#allocation4 + $0x178] sm:$0xff]  ;;  %v1588_v41 = vld [vmem:[#allocation4 + $0x140] sm:$0xff] }
 0x210   : > { %1077 = vmatpush.msra.mxu2 %v1530_v48  ;;  %1097 = vmatpush.msra.mxu3 %v1531_v39  ;;  %v1589_v48 = vld [vmem:[#allocation4 + $0x148] sm:$0xff]  ;;  %v1590_v39 = vld [vmem:[#allocation4 + $0x150] sm:$0xff] }
 0x211   : > { %1038 = vmatpush.msra.mxu0 %v1532_v40  ;;  %1058 = vmatpush.msra.mxu1 %v1533_v37  ;;  %v1591_v40 = vld [vmem:[#allocation4 + $0x158] sm:$0xff]  ;;  %v1592_v37 = vld [vmem:[#allocation4 + $0x120] sm:$0xff] }
 0x212   : > { %1078 = vmatpush.msra.mxu2 %v1534_v1  ;;  %1098 = vmatpush.msra.mxu3 %v1535_v2  ;;  %v1593_v1 = vld [vmem:[#allocation4 + $0x128] sm:$0xff]  ;;  %v1594_v2 = vld [vmem:[#allocation4 + $0x130] sm:$0xff] }
 0x213   : > { %1039 = vmatpush.msra.mxu0 %v1536_v3  ;;  %1059 = vmatpush.msra.mxu1 %v1537_v4  ;;  %v1595_v3 = vld [vmem:[#allocation4 + $0x138] sm:$0xff]  ;;  %v1596_v4 = vld [vmem:[#allocation4 + $0x100] sm:$0xff] }
 0x214   : > { %1079 = vmatpush.msra.mxu2 %v1538_v5  ;;  %1099 = vmatpush.msra.mxu3 %v1539_v6  ;;  %v1597_v5 = vld [vmem:[#allocation4 + $0x108] sm:$0xff]  ;;  %v1598_v6 = vld [vmem:[#allocation4 + $0x110] sm:$0xff] }
 0x215   : > { %1040 = vmatpush.msra.mxu0 %v1540_v7  ;;  %1060 = vmatpush.msra.mxu1 %v1541_v8  ;;  %v1599_v7 = vld [vmem:[#allocation4 + $0x118] sm:$0xff]  ;;  %v1600_v8 = vld [vmem:[#allocation4 + $0xe0] sm:$0xff] }
 0x216   : > { %1080 = vmatpush.msra.mxu2 %v1542_v9  ;;  %1100 = vmatpush.msra.mxu3 %v1543_v10  ;;  %v1601_v9 = vld [vmem:[#allocation4 + $0xe8] sm:$0xff]  ;;  %v1602_v10 = vld [vmem:[#allocation4 + $0xf0] sm:$0xff] }
 0x217   : > { %1041 = vmatpush.msra.mxu0 %v1544_v11  ;;  %1061 = vmatpush.msra.mxu1 %v1545_v12  ;;  %v1603_v11 = vld [vmem:[#allocation4 + $0xf8] sm:$0xff]  ;;  %v1604_v12 = vld [vmem:[#allocation4 + $0xc0] sm:$0xff] }
 0x218   : > { %1081 = vmatpush.msra.mxu2 %v1546_v13  ;;  %1101 = vmatpush.msra.mxu3 %v1547_v14  ;;  %v1605_v13 = vld [vmem:[#allocation4 + $0xc8] sm:$0xff]  ;;  %v1606_v14 = vld [vmem:[#allocation4 + $0xd0] sm:$0xff] }
 0x219   : > { %1042 = vmatpush.msra.mxu0 %v1548_v15  ;;  %1062 = vmatpush.msra.mxu1 %v1549_v16  ;;  %v1607_v15 = vld [vmem:[#allocation4 + $0xd8] sm:$0xff]  ;;  %v1608_v16 = vld [vmem:[#allocation4 + $0xa0] sm:$0xff] }
 0x21a   : > { %1082 = vmatpush.msra.mxu2 %v1550_v17  ;;  %1102 = vmatpush.msra.mxu3 %v1551_v18  ;;  %v1609_v17 = vld [vmem:[#allocation4 + $0xa8] sm:$0xff]  ;;  %v1610_v18 = vld [vmem:[#allocation4 + $0xb0] sm:$0xff] }
 0x21b   : > { %1043 = vmatpush.msra.mxu0 %v1552_v19  ;;  %1063 = vmatpush.msra.mxu1 %v1553_v20  ;;  %v1611_v19 = vld [vmem:[#allocation4 + $0xb8] sm:$0xff]  ;;  %v1612_v20 = vld [vmem:[#allocation4 + $0x80] sm:$0xff] }
 0x21c   : > { %1083 = vmatpush.msra.mxu2 %v1554_v22  ;;  %1103 = vmatpush.msra.mxu3 %v1555_v23  ;;  %v1613_v22 = vld [vmem:[#allocation4 + $0x88] sm:$0xff]  ;;  %v1614_v23 = vld [vmem:[#allocation4 + $0x90] sm:$0xff] }
 0x21d   : > { %1044 = vmatpush.msra.mxu0 %v1556_v24  ;;  %1064 = vmatpush.msra.mxu1 %v1557_v25  ;;  %v1615_v24 = vld [vmem:[#allocation4 + $0x98] sm:$0xff]  ;;  %v1616_v25 = vld [vmem:[#allocation4 + $0x60] sm:$0xff] }
 0x21e   : > { %1084 = vmatpush.msra.mxu2 %v1558_v26  ;;  %1104 = vmatpush.msra.mxu3 %v1559_v27  ;;  %v1617_v26 = vld [vmem:[#allocation4 + $0x68] sm:$0xff]  ;;  %v1618_v27 = vld [vmem:[#allocation4 + $0x70] sm:$0xff] }
 0x21f   : > { %1045 = vmatpush.msra.mxu0 %v1560_v28  ;;  %1065 = vmatpush.msra.mxu1 %v1561_v29  ;;  %v1619_v28 = vld [vmem:[#allocation4 + $0x78] sm:$0xff]  ;;  %v1620_v29 = vld [vmem:[#allocation4 + $0x40] sm:$0xff] }
 0x220   : > { %1085 = vmatpush.msra.mxu2 %v1562_v45  ;;  %1105 = vmatpush.msra.mxu3 %v1563_v30  ;;  %v1621_v45 = vld [vmem:[#allocation4 + $0x48] sm:$0xff]  ;;  %v1622_v30 = vld [vmem:[#allocation4 + $0x50] sm:$0xff] }
 0x221   : > { %1046 = vmatpush.msra.mxu0 %v1564_v31  ;;  %1066 = vmatpush.msra.mxu1 %v1565_v32  ;;  %v1623_v31 = vld [vmem:[#allocation4 + $0x58] sm:$0xff]  ;;  %v1624_v32 = vld [vmem:[#allocation4 + $0x20] sm:$0xff] }
 0x222   : > { %1086 = vmatpush.msra.mxu2 %v1566_v33  ;;  %1106 = vmatpush.msra.mxu3 %v1567_v34  ;;  %v1625_v33 = vld [vmem:[#allocation4 + $0x28] sm:$0xff]  ;;  %v1626_v34 = vld [vmem:[#allocation4 + $0x30] sm:$0xff] }
 0x223   : > { %1111 = vmatpush.msrb.mxu0 %v1568_v36  ;;  %1131 = vmatpush.msrb.mxu1 %v1569_v42  ;;  %v1627_v36 = vld [vmem:[#allocation4 + $0x38] sm:$0xff]  ;;  %v1628_v42 = vld [vmem:[#allocation4] sm:$0xff] }
 0x224   : > { %1151 = vmatpush.msrb.mxu2 %v1570_v46  ;;  %1171 = vmatpush.msrb.mxu3 %v1571_v62  ;;  %v1629_v46 = vld [vmem:[#allocation4 + $0x8] sm:$0xff]  ;;  %v1630_v62 = vld [vmem:[#allocation4 + $0x10] sm:$0xff] }
 0x225   : > { %1112 = vmatpush.msrb.mxu0 %v1572_v53  ;;  %1132 = vmatpush.msrb.mxu1 %v1573_v60  ;;  %v1631_v53 = vld [vmem:[#allocation4 + $0x18] sm:$0xff] }
 0x226   : > { %1152 = vmatpush.msrb.mxu2 %v1574_v55  ;;  %1172 = vmatpush.msrb.mxu3 %v1575_v49 }
 0x227   : > { %1113 = vmatpush.msrb.mxu0 %v1576_v57  ;;  %1133 = vmatpush.msrb.mxu1 %v1577_v59 }
 0x228   : > { %1153 = vmatpush.msrb.mxu2 %v1578_v56  ;;  %1173 = vmatpush.msrb.mxu3 %v1579_v0 }
 0x229   : > { %1114 = vmatpush.msrb.mxu0 %v1580_v50  ;;  %1134 = vmatpush.msrb.mxu1 %v1581_v58 }
 0x22a   : > { %1154 = vmatpush.msrb.mxu2 %v1582_v63  ;;  %1174 = vmatpush.msrb.mxu3 %v1583_v61 }
 0x22b   : > { %1115 = vmatpush.msrb.mxu0 %v1584_v51  ;;  %1135 = vmatpush.msrb.mxu1 %v1585_v52 }
 0x22c   : > { %1155 = vmatpush.msrb.mxu2 %v1586_v47  ;;  %1175 = vmatpush.msrb.mxu3 %v1587_v54 }
 0x22d   : > { %1116 = vmatpush.msrb.mxu0 %v1588_v41  ;;  %1136 = vmatpush.msrb.mxu1 %v1589_v48 }
 0x22e   : > { %1156 = vmatpush.msrb.mxu2 %v1590_v39  ;;  %1176 = vmatpush.msrb.mxu3 %v1591_v40 }
 0x22f   : > { %1117 = vmatpush.msrb.mxu0 %v1592_v37  ;;  %1137 = vmatpush.msrb.mxu1 %v1593_v1 }
 0x230   : > { %1157 = vmatpush.msrb.mxu2 %v1594_v2  ;;  %1177 = vmatpush.msrb.mxu3 %v1595_v3 }
 0x231   : > { %1118 = vmatpush.msrb.mxu0 %v1596_v4  ;;  %1138 = vmatpush.msrb.mxu1 %v1597_v5 }
 0x232   : > { %1158 = vmatpush.msrb.mxu2 %v1598_v6  ;;  %1178 = vmatpush.msrb.mxu3 %v1599_v7 }
 0x233   : > { %1119 = vmatpush.msrb.mxu0 %v1600_v8  ;;  %1139 = vmatpush.msrb.mxu1 %v1601_v9 }
 0x234   : > { %1159 = vmatpush.msrb.mxu2 %v1602_v10  ;;  %1179 = vmatpush.msrb.mxu3 %v1603_v11 }
 0x235   : > { %1120 = vmatpush.msrb.mxu0 %v1604_v12  ;;  %1140 = vmatpush.msrb.mxu1 %v1605_v13 }
 0x236   : > { %1160 = vmatpush.msrb.mxu2 %v1606_v14  ;;  %1180 = vmatpush.msrb.mxu3 %v1607_v15 }
 0x237   : > { %1121 = vmatpush.msrb.mxu0 %v1608_v16  ;;  %1141 = vmatpush.msrb.mxu1 %v1609_v17 }
 0x238   : > { %1161 = vmatpush.msrb.mxu2 %v1610_v18  ;;  %1181 = vmatpush.msrb.mxu3 %v1611_v19 }
 0x239   : > { %1122 = vmatpush.msrb.mxu0 %v1612_v20  ;;  %1142 = vmatpush.msrb.mxu1 %v1613_v22 }
 0x23a   : > { %1162 = vmatpush.msrb.mxu2 %v1614_v23  ;;  %1182 = vmatpush.msrb.mxu3 %v1615_v24 }
 0x23b   : > { %1123 = vmatpush.msrb.mxu0 %v1616_v25  ;;  %1143 = vmatpush.msrb.mxu1 %v1617_v26 }
 0x23c   : > { %1163 = vmatpush.msrb.mxu2 %v1618_v27  ;;  %1183 = vmatpush.msrb.mxu3 %v1619_v28 }
 0x23d   : > { %1124 = vmatpush.msrb.mxu0 %v1620_v29  ;;  %1144 = vmatpush.msrb.mxu1 %v1621_v45 }
 0x23e   : > { %1164 = vmatpush.msrb.mxu2 %v1622_v30  ;;  %1184 = vmatpush.msrb.mxu3 %v1623_v31 }
 0x23f   : > { %1125 = vmatpush.msrb.mxu0 %v1624_v32  ;;  %1145 = vmatpush.msrb.mxu1 %v1625_v33 }
 0x240   : > { %1165 = vmatpush.msrb.mxu2 %v1626_v34  ;;  %1185 = vmatpush.msrb.mxu3 %v1627_v36 }
 0x241   : > { %1126 = vmatpush.msrb.mxu0 %v1628_v42  ;;  %1146 = vmatpush.msrb.mxu1 %v1629_v46 }
 0x242   : > { %1166 = vmatpush.msrb.mxu2 %v1630_v62  ;;  %1186 = vmatpush.msrb.mxu3 %v1631_v53 }
 0x27c   : > { %v817_v60 = vpop.f32.mrf.mxu0  ;;  %v837_v55 = vpop.f32.mrf.mxu1 }
 0x283   : > { %v877_v49 = vpop.f32.mrf.mxu3  ;;  %v857_v63 = vpop.f32.mrf.mxu2 }
 0x284   : > { %v897_v57 = vpop.f32.mrf.mxu0  ;;  %v917_v59 = vpop.f32.mrf.mxu1 }
 0x285   : > { %v898_v56 = vadd.f32 %v897_v57, %v817_v60  ;;  %v918_v0 = vadd.f32 %v917_v59, %v837_v55 }
 0x287   : > { %v960_v50 = vadd.f32 %v898_v56, %v3089_v35  ;;  %v961_v58 = vadd.f32 %v918_v0, %v3090_v38 }
 0x289   : > { %v1370_v61 = vmul.f32 -1.442695, %v960_v50  ;;  %v1371_v51 = vmul.f32 -1.442695, %v961_v58 }
 0x28b   : > { %1472 = vpow2.f32 %v1370_v61  ;;  %v957_v52 = vpop.f32.mrf.mxu3  ;;  %v937_v1 = vpop.f32.mrf.mxu2 }
 0x28c   : > { %1474 = vpow2.f32 %v1371_v51  ;;  %v958_v47 = vadd.f32 %v957_v52, %v877_v49  ;;  %v938_v2 = vadd.f32 %v937_v1, %v857_v63 }
 0x28e   : > { %v963_v54 = vadd.f32 %v958_v47, %v3091_v44  ;;  %v962_v6 = vadd.f32 %v938_v2, %v3092_v43 }
 0x290   : > { %v1372_v41 = vmul.f32 -1.442695, %v963_v54 }
 0x291   : > { %v1473_v48 = vpop.eup %1472 }
 0x292   : > { %v1475_v39 = vpop.eup %1474  ;;  %v967_v40 = vadd.f32 1.0, %v1473_v48  ;;  %1476 = vpow2.f32 %v1372_v41 }
 0x293   : > { %v986_v37 = vadd.f32 1.0, %v1475_v39 }
 0x294   : > { %1478 = vrcp.f32 %v967_v40  ;;  %v979_v12 = vand.u32 2147483648, %v967_v40  ;;  %v977_v15 = vand.u32 2147483647, %v967_v40  ;;  %vm973_vm10 = vweird.f32 %v967_v40 }
 0x295   : > { %1480 = vrcp.f32 %v986_v37  ;;  %v998_v13 = vand.u32 2147483648, %v986_v37  ;;  %v996_v17 = vand.u32 2147483647, %v986_v37  ;;  %vm992_vm11 = vweird.f32 %v986_v37 }
 0x296   : > { %v980_v20 = vor.u32 1.1754944e-38, %v979_v12  ;;  %vm978_vm14 = vcmp.eq.f32.partialorder %v977_v15, 8.507059e+37 }
 0x297   : > { %v999_v24 = vor.u32 1.1754944e-38, %v998_v13  ;;  %vm997_vm15 = vcmp.eq.f32.partialorder %v996_v17, 8.507059e+37 }
 0x298   : > { %v1477_v3 = vpop.eup %1476 }
 0x299   : > { %v1006_v4 = vadd.f32 1.0, %v1477_v3 }
 0x29a   : > { %v1479_v5 = vpop.eup %1478 }
 0x29b   : > { %v1481_v7 = vpop.eup %1480  ;;  %v969_v8 = vmul.f32 %v1479_v5, %v967_v40  ;;  %1482 = vrcp.f32 %v1006_v4  ;;  %vm974_vm8 = vweird.f32 %v1479_v5  ;;  %v1018_v36 = vand.u32 2147483648, %v1006_v4 }
 0x29c   : > { %v988_v9 = vmul.f32 %v1481_v7, %v986_v37  ;;  %1484 = vtanh.f32 %v962_v6  ;;  %vm993_vm9 = vweird.f32 %v1481_v7  ;;  %vm975_vm12 = vmor %vm973_vm10, %vm974_vm8  ;;  %vm1012_vm1 = vweird.f32 %v1006_v4 }
 0x29d   : > { %v970_v10 = vsub.f32 1.0, %v969_v8  ;;  %vm994_vm13 = vmor %vm992_vm11, %vm993_vm9  ;;  %v1016_v42 = vand.u32 2147483647, %v1006_v4  ;;  %v1019_v62 = vor.u32 1.1754944e-38, %v1018_v36 }
 0x29e   : > { %v989_v11 = vsub.f32 1.0, %v988_v9 }
 0x29f   : > { %v971_v14 = vmul.f32 %v1479_v5, %v970_v10  ;;  %vm1017_vm3 = vcmp.eq.f32.partialorder %v1016_v42, 8.507059e+37 }
 0x2a0   : > { %v990_v16 = vmul.f32 %v1481_v7, %v989_v11 }
 0x2a1   : > { %v1483_v18 = vpop.eup %1482  ;;  %v972_v19 = vadd.f32 %v1479_v5, %v971_v14 }
 0x2a2   : > { %v991_v22 = vadd.f32 %v1481_v7, %v990_v16  ;;  %v1008_v23 = vmul.f32 %v1483_v18, %v1006_v4  ;;  %v1485_v26 = vpop.eup %1484  ;;  %vm1013_vm0 = vweird.f32 %v1483_v18 }
 0x2a3   : > { %v976_v25 = vsel %vm975_vm12, %v1479_v5, %v972_v19  ;;  %vm1014_vm2 = vmor %vm1012_vm1, %vm1013_vm0 }
 0x2a4   : > { %v981_v27 = vsel %vm978_vm14, %v980_v20, %v976_v25  ;;  %v995_v28 = vsel %vm994_vm13, %v1481_v7, %v991_v22  ;;  %v1009_v29 = vsub.f32 1.0, %v1008_v23 }
 0x2a5   : > { %v1000_v45 = vsel %vm997_vm15, %v999_v24, %v995_v28  ;;  %v1023_v30 = vmul.f32 %v1485_v26, %v981_v27 }
 0x2a6   : > { %v1022_v31 = vmul.f32 %v1000_v45, %v2612_v21  ;;  %v1010_v32 = vmul.f32 %v1483_v18, %v1009_v29  ;;  %v1374_v21 = vld [vmem:[%s1931_s14 + $0x18] sm:$0xff]  ;;  %s1385_s14 = sshll.u32 %s1862_s19, 5  ;;  %s1263_s19 = scalar_lea.sflag [#allocation9], %s1927_s7 }
 0x2a7   : > { %s1274_s20 = scalar_lea.hbm %s2671_s4, %s1385_s14 }
 0x2a8   : > { %v2622_v33 = vadd.f32 %v1023_v30, %v1022_v31  ;;  %v1011_v34 = vadd.f32 %v1483_v18, %v1010_v32  ;;  %s1277_s26 = sshll.u32 %s1274_s20, 4  ;;  %s1278_s26 = int_to_ptr.hbm [resolvable:$true] %s1277_s26 }
 0x2a9   : > { %s1748_s23 = sshra.s32 %s1278_s26, 4  ;;  %s1749_s23 = int_to_ptr.hbm [resolvable:$true] %s1748_s23 }
 0x2aa   : > { %1486 = vtanh.f32 %v2622_v33  ;;  %v1015_v46 = vsel %vm1014_vm2, %v1483_v18, %v1011_v34  ;;  %s1750_s25 = scalar_lea.hbm %s1749_s23, 32  ;;  %p1755_p1 = scmp.lt.s32.totalorder %s1749_s23, %s2671_s4 }
 0x2ab   : > { %v1020_v60 = vsel %vm1017_vm3, %v1019_v62, %v1015_v46  ;;  %p1751_p6 = scmp.ne.s32.totalorder %s1749_s23, %s1750_s25  ;;  %p1756_p3 = scmp.lt.s32.totalorder %s1754_s29, %s1750_s25 }
 0x2ad   : > { %p1752_p13 = pnand %p1751_p6, %p1891_p11  ;;  %p1757_p4 = por %p1756_p3, %p1755_p1 }
 0x2af   : > { %p1753_p0 = pneg %p1752_p13 }
 0x2b0   : > { %v1487_v53 = vpop.eup %1486 }
 0x2b1   : > { %v1026_v55 = vmul.f32 %v1487_v53, %v1020_v60  ;;  %p1758_p7 = pnand %p1757_p4, %p1753_p0 }
 0x2b3   : > { %1047 = vmatmul.f32.vlgmr.msra.gmra.mxu0 %v1026_v55  ;;  %1373 = vst [vmem:[%s1937_s9 + $0x10] sm:$0xff] %v1026_v55  ;;  %1067 = vmatmul.f32.vlgmr.msra.gmra.mxu1 %v1026_v55 }
 0x2b4   : > { %1087 = vmatmul.f32.vlgmr.msra.gmra.mxu2 %v1026_v55  ;;  %1107 = vmatmul.f32.vlgmr.msra.gmra.mxu3 %v1026_v55 }
 0x2bb   : > { %1127 = vmatmul.f32.vlgmr.msrb.gmra.mxu0 %v1374_v21  ;;  %1147 = vmatmul.f32.vlgmr.msrb.gmra.mxu1 %v1374_v21 }
 0x2bc   : > { %1167 = vmatmul.f32.vlgmr.msrb.gmra.mxu2 %v1374_v21  ;;  %1187 = vmatmul.f32.vlgmr.msrb.gmra.mxu3 %v1374_v21 }
 0x330   : > { %v1048_v49 = vpop.f32.mrf.mxu0  ;;  %v1068_v57 = vpop.f32.mrf.mxu1 }
 0x337   : > { %v1108_v59 = vpop.f32.mrf.mxu3  ;;  %v1088_v51 = vpop.f32.mrf.mxu2 }
 0x338   : > { %v1128_v56 = vpop.f32.mrf.mxu0  ;;  %v1148_v0 = vpop.f32.mrf.mxu1 }
 0x339   : > { %v1129_v50 = vadd.f32 %v1128_v56, %v1048_v49  ;;  %v1149_v58 = vadd.f32 %v1148_v0, %v1068_v57 }
 0x33b   : > { %v1191_v63 = vadd.f32 %v1129_v50, %v3089_v35  ;;  %v1192_v61 = vadd.f32 %v1149_v58, %v3090_v38 }
 0x33d   : > { %v1375_v52 = vmul.f32 -1.442695, %v1191_v63  ;;  %v1376_v47 = vmul.f32 -1.442695, %v1192_v61 }
 0x33f   : > { %1488 = vpow2.f32 %v1375_v52  ;;  %v1188_v54 = vpop.f32.mrf.mxu3  ;;  %v1168_v3 = vpop.f32.mrf.mxu2 }
 0x340   : > { %1490 = vpow2.f32 %v1376_v47  ;;  %v1189_v41 = vadd.f32 %v1188_v54, %v1108_v59  ;;  %v1169_v35 = vadd.f32 %v1168_v3, %v1088_v51 }
 0x342   : > { %v1194_v48 = vadd.f32 %v1189_v41, %v3091_v44  ;;  %v1193_v6 = vadd.f32 %v1169_v35, %v3092_v43 }
 0x344   : > { %v1377_v39 = vmul.f32 -1.442695, %v1194_v48 }
 0x345   : > { %v1489_v40 = vpop.eup %1488 }
 0x346   : > { %v1491_v37 = vpop.eup %1490  ;;  %v1198_v1 = vadd.f32 1.0, %v1489_v40  ;;  %1492 = vpow2.f32 %v1377_v39 }
 0x347   : > { %v1217_v2 = vadd.f32 1.0, %v1491_v37 }
 0x348   : > { %1494 = vrcp.f32 %v1198_v1  ;;  %v1210_v11 = vand.u32 2147483648, %v1198_v1  ;;  %v1208_v14 = vand.u32 2147483647, %v1198_v1  ;;  %vm1204_vm6 = vweird.f32 %v1198_v1 }
 0x349   : > { %1496 = vrcp.f32 %v1217_v2  ;;  %v1229_v12 = vand.u32 2147483648, %v1217_v2  ;;  %v1227_v16 = vand.u32 2147483647, %v1217_v2  ;;  %vm1223_vm7 = vweird.f32 %v1217_v2 }
 0x34a   : > { %v1211_v43 = vor.u32 1.1754944e-38, %v1210_v11  ;;  %vm1209_vm10 = vcmp.eq.f32.partialorder %v1208_v14, 8.507059e+37 }
 0x34b   : > { %v1230_v22 = vor.u32 1.1754944e-38, %v1229_v12  ;;  %vm1228_vm11 = vcmp.eq.f32.partialorder %v1227_v16, 8.507059e+37 }
 0x34c   : > { %v1493_v38 = vpop.eup %1492 }
 0x34d   : > { %v1237_v4 = vadd.f32 1.0, %v1493_v38 }
 0x34e   : > { %v1495_v5 = vpop.eup %1494 }
 0x34f   : > { %v1497_v7 = vpop.eup %1496  ;;  %v1200_v8 = vmul.f32 %v1495_v5, %v1198_v1  ;;  %1498 = vrcp.f32 %v1237_v4  ;;  %vm1205_vm4 = vweird.f32 %v1495_v5  ;;  %v1249_v34 = vand.u32 2147483648, %v1237_v4 }
 0x350   : > { %v1219_v9 = vmul.f32 %v1497_v7, %v1217_v2  ;;  %1500 = vtanh.f32 %v1193_v6  ;;  %vm1224_vm5 = vweird.f32 %v1497_v7  ;;  %vm1206_vm8 = vmor %vm1204_vm6, %vm1205_vm4  ;;  %vm1243_vm13 = vweird.f32 %v1237_v4 }
 0x351   : > { %v1201_v44 = vsub.f32 1.0, %v1200_v8  ;;  %vm1225_vm9 = vmor %vm1223_vm7, %vm1224_vm5  ;;  %v1247_v36 = vand.u32 2147483647, %v1237_v4  ;;  %v1250_v46 = vor.u32 1.1754944e-38, %v1249_v34 }
 0x352   : > { %v1220_v10 = vsub.f32 1.0, %v1219_v9 }
 0x353   : > { %v1202_v13 = vmul.f32 %v1495_v5, %v1201_v44  ;;  %vm1248_vm15 = vcmp.eq.f32.partialorder %v1247_v36, 8.507059e+37 }
 0x354   : > { %v1221_v15 = vmul.f32 %v1497_v7, %v1220_v10 }
 0x355   : > { %v1499_v17 = vpop.eup %1498  ;;  %v1203_v18 = vadd.f32 %v1495_v5, %v1202_v13 }
 0x356   : > { %v1222_v19 = vadd.f32 %v1497_v7, %v1221_v15  ;;  %v1239_v20 = vmul.f32 %v1499_v17, %v1237_v4  ;;  %v1501_v24 = vpop.eup %1500  ;;  %vm1244_vm12 = vweird.f32 %v1499_v17 }
 0x357   : > { %v1207_v23 = vsel %vm1206_vm8, %v1495_v5, %v1203_v18  ;;  %vm1245_vm14 = vmor %vm1243_vm13, %vm1244_vm12 }
 0x358   : > { %v1212_v25 = vsel %vm1209_vm10, %v1211_v43, %v1207_v23  ;;  %v1226_v26 = vsel %vm1225_vm9, %v1497_v7, %v1222_v19  ;;  %v1240_v27 = vsub.f32 1.0, %v1239_v20 }
 0x359   : > { %v1231_v28 = vsel %vm1228_vm11, %v1230_v22, %v1226_v26  ;;  %v1254_v29 = vmul.f32 %v1501_v24, %v1212_v25 }
 0x35a   : > { %v1253_v45 = vmul.f32 %v1231_v28, %v2622_v33  ;;  %v1241_v30 = vmul.f32 %v1499_v17, %v1240_v27 }
 0x35c   : > { %v1255_v31 = vadd.f32 %v1254_v29, %v1253_v45  ;;  %v1242_v32 = vadd.f32 %v1499_v17, %v1241_v30 }
 0x35e   : > { %1502 = vtanh.f32 %v1255_v31  ;;  %1261 = vst [vmem:[#allocation3] sm:$0xff] %v1255_v31  ;;  %v1246_v42 = vsel %vm1245_vm14, %v1499_v17, %v1242_v32 }
 0x35f   : > { %v1251_v62 = vsel %vm1248_vm15, %v1250_v46, %v1246_v42 }
 0x364   : > { %v1503_v33 = vpop.eup %1502 }
 0x365   : > { %v1257_v53 = vmul.f32 %v1503_v33, %v1251_v62 }
 0x367   : > { %1260 = vst [vmem:[#allocation2] sm:$0xff] %v1257_v53 }
 0x368   : > { %1378 = vst [vmem:[%s1937_s9 + $0x18] sm:$0xff] %v1257_v53 }
 0x369   : > { %1761 = shalt.err (!%p1758_p7)
}
 0x36a   : > { %s1814_s7 = smov 128   ;;  %s1815_s9 = smov 8  }
 0x36b   : > { %1388 = dma.vmem_to_hbm [thread:$0]  (%p1891_p11), %s1276_s22, 512, %s1278_s26, %s1263_s19, %s1814_s7, %s1814_s7, %s1815_s9  }
 0x36c PF: > { %s1292_s10 = sand.u32 1, %s1794_s15   ;;  %p3093_p5 = scmp.ge.s32.totalorder %s1806_s18, 2 }
 0x36d   : > { %s1293_s11 = scalar_lea.sflag [#allocation9], %s1292_s10 }
 0x36e   : > { %p1395_p8 = pnand %p3093_p5, %p1895_p12 }
 0x370   : > { %p1396_p10 = pneg %p1395_p8 }
 0x372   : > { %1789 = dma.done.wait (%p1396_p10), %s1293_s11, 512  }
 0x373   : > { %1791 = vsyncadd (%p1396_p10), %s1293_s11, 4294966784  ;;  %p17_p2 = scmp.ge.s32.totalorder %s1866_s21, 4   ;;  %s3094_s15 = smov %s1798_s16 }
 0x374   : > { %s3095_s16 = smov %s1802_s17  ;;  %s3096_s17 = smov %s1878_s24 }
 0x375   : > { %s3097_s18 = smov %s1866_s21  ;;  %19 = sbr.rel (!%p17_p2) target bundleno = 5 (0x5), region = 94 }
 0x37a   :  { %1299 = vsyncpa [#allocation8], 1 }
 0x37b   :  { %1301 = vsyncpa [#allocation8 + $0x1], 1 }
 0x37c   :  { %1302 = vsyncpa [#allocation9], 1 }
 0x37d   :  { %1304 = vsyncpa [#allocation9 + $0x1], 1 }

</bundles_post_ra>
